<compile_context>
chip_gen: v6e
topology: v6e:2x2x1
jax: 0.10.0
libtpu: 0.0.40
codegen_flags: <defaults>
</compile_context>

<pallas_src>
import functools

import numpy as np

import jax
import jax.numpy as jnp
from jax import lax
from jax.experimental import pallas as pl
from jax.experimental.pallas import tpu as pltpu


def _final_layer_kernel(x_ref, masks_ref, w1_ref, w2_ref, b2_ref, out_ref, *,
                        H, W, C, Cp, NB, eps, neg_slope):
    """NB batch elements per grid step.

    x_ref    : (NB, Cp, L)  input slabs, channels on sublanes (rows >= C are
                            zero), L = H*W spatial positions on lanes
    masks_ref: (9*Cp, L)    border-validity masks, pre-broadcast per tap
                            (implements the 3x3 conv's zero padding)
    w1_ref   : (C, 9*Cp)    im2col conv1 weights (padded-cin columns are zero)
    w2_ref   : (3, C)       1x1 conv weights
    b2_ref   : (3, 1)
    out_ref  : (NB, 3, L)   lane-dense output slabs
    """
    L = H * W
    masks = masks_ref[...]                                    # (9*Cp, L)
    xs = [x_ref[n] for n in range(NB)]                        # NB x (Cp, L)

    # Batched im2col operand (9*Cp, NB*L) built entirely in registers:
    # 9 lane-rolled copies per element, masked to zero outside the image.
    cols = []
    for n in range(NB):
        taps = []
        for dy in (-1, 0, 1):
            for dx in (-1, 0, 1):
                off = dy * W + dx                             # flattened offset
                taps.append(xs[n] if off == 0
                            else pltpu.roll(xs[n], shift=(-off) % L, axis=1))
        cols.append(jnp.concatenate(taps, axis=0) * masks)    # (9*Cp, L)
    im2col = cols[0] if NB == 1 else jnp.concatenate(cols, axis=1)

    # conv1: one MXU matmul, K = 9*Cp, lane dim NB*L.  The conv bias b1 is
    # omitted on purpose: the non-affine InstanceNorm subtracts the
    # per-channel mean, so a per-channel bias cancels exactly.
    conv1 = jnp.dot(w1_ref[...], im2col,
                    preferred_element_type=jnp.float32,
                    precision=lax.Precision.HIGHEST)          # (C, NB*L)

    # Per-element InstanceNorm2d (no affine, biased variance) + LeakyReLU +
    # residual, on lane-aligned L-wide column slices.
    res = []
    for n in range(NB):
        c = conv1[:, n * L:(n + 1) * L]                       # (C, L)
        mean = jnp.mean(c, axis=1, keepdims=True)
        cent = c - mean
        var = jnp.mean(cent * cent, axis=1, keepdims=True)
        xn = cent * lax.rsqrt(var + eps)
        xn = jnp.where(xn >= 0, xn, neg_slope * xn)
        res.append(xn + xs[n][:C, :])                         # residual add
    xr = res[0] if NB == 1 else jnp.concatenate(res, axis=1)  # (C, NB*L)

    # conv2: 1x1 conv == (3, C) @ (C, NB*L) matmul, lane-dense output stores.
    out = jnp.dot(w2_ref[...], xr,
                  preferred_element_type=jnp.float32,
                  precision=lax.Precision.HIGHEST) + b2_ref[...]   # (3, NB*L)
    for n in range(NB):
        out_ref[n] = out[:, n * L:(n + 1) * L]


def _grid_steps(N):
    """Batch-folding policy.  Single-TC chips (v5e/v6e): one fat grid step so
    the whole batch amortizes the per-step pipeline overhead.  Dual-TC v7x:
    keep >= 2 steps so dimension_semantics=("parallel",) uses both cores."""
    if N <= 1:
        return max(N, 1)
    try:
        dual_tc = "v7" in jax.devices()[0].device_kind.lower()
    except Exception:          # perf-only heuristic; never block correctness
        dual_tc = False
    if dual_tc:
        return 2 if N % 2 == 0 else N
    return 1


def final_layer_forward(x_nchw, w1, b1, w2, b2, *, eps=1e-5, neg_slope=0.01):
    """x_nchw: (N, C, H, W) float32.  Returns (N, 3, H, W) float32.

    b1 is accepted for API parity with the PyTorch module but is mathematically
    dead: InstanceNorm2d(affine=False) removes any per-channel conv1 bias.
    """
    del b1                       # cancelled exactly by the non-affine InstanceNorm
    N, C, H, W = x_nchw.shape
    L = H * W
    Cp = ((C + 7) // 8) * 8      # channels rounded up to the sublane tile

    G = _grid_steps(N)           # number of grid steps
    NB = N // G                  # batch elements folded per step

    # NCHW -> (N, Cp, H*W): reshape + tiny zero channel-pad; no transposes.
    x_flat = x_nchw.reshape(N, C, L).astype(jnp.float32)
    x_flat = jnp.pad(x_flat, ((0, 0), (0, Cp - C), (0, 0)))

    # conv1 weights (Cout, Cin, 3, 3) -> im2col matrix (Cout, 9*Cp); column
    # index = (kh*3 + kw)*Cp + cin; padded-cin columns are zero.
    w1m = jnp.transpose(w1.astype(jnp.float32), (0, 2, 3, 1))        # (C,3,3,C)
    w1m = jnp.pad(w1m, ((0, 0), (0, 0), (0, 0), (0, Cp - C)))
    w1m = w1m.reshape(C, 9 * Cp)
    w2m = w2.reshape(3, C).astype(jnp.float32)                       # 1x1 conv
    b2c = b2.reshape(3, 1).astype(jnp.float32)

    # Border-validity masks for the 9 taps (trace-time numpy constants),
    # pre-broadcast over the Cp sublanes so the kernel does a plain multiply.
    rows, cols_ = np.divmod(np.arange(L), W)
    mask_rows = []
    for dy in (-1, 0, 1):
        for dx in (-1, 0, 1):
            valid = ((rows + dy >= 0) & (rows + dy < H) &
                     (cols_ + dx >= 0) & (cols_ + dx < W)).astype(np.float32)
            mask_rows.append(np.broadcast_to(valid, (Cp, L)))
    masks = jnp.asarray(np.concatenate(mask_rows, axis=0))           # (9*Cp, L)

    kernel = functools.partial(_final_layer_kernel, H=H, W=W, C=C, Cp=Cp,
                               NB=NB, eps=eps, neg_slope=neg_slope)

    # VMEM budget derived from the actual block sizes (double-buffered
    # operands + the im2col slab as spill headroom), with a generous floor.
    block_bytes = 4 * (NB * Cp * L + 9 * Cp * L + C * 9 * Cp
                       + 3 * C + 3 + NB * 3 * L)
    slab_bytes = 4 * 9 * Cp * NB * L
    vmem_limit = int(min(64 << 20,
                         max(16 << 20,
                             4 * block_bytes + 2 * slab_bytes + (1 << 20))))

    out_flat = pl.pallas_call(
        kernel,
        out_shape=jax.ShapeDtypeStruct((N, 3, L), jnp.float32),
        grid_spec=pltpu.PrefetchScalarGridSpec(
            num_scalar_prefetch=0,
            grid=(G,),
            in_specs=[
                pl.BlockSpec((NB, Cp, L), lambda g: (g, 0, 0)),
                pl.BlockSpec((9 * Cp, L), lambda g: (0, 0)),
                pl.BlockSpec((C, 9 * Cp), lambda g: (0, 0)),
                pl.BlockSpec((3, C), lambda g: (0, 0)),
                pl.BlockSpec((3, 1), lambda g: (0, 0)),
            ],
            out_specs=pl.BlockSpec((NB, 3, L), lambda g: (g, 0, 0)),
        ),
        compiler_params=pltpu.CompilerParams(
            dimension_semantics=("parallel",),
            vmem_limit_bytes=vmem_limit,
        ),
    )(x_flat, masks, w1m, w2m, b2c)

    # (N, 3, H*W) -> NCHW: pure reshape, no transpose.
    return out_flat.reshape(N, 3, H, W)


def _reference(x, w1, b1, w2, b2, eps=1e-5, neg_slope=0.01):
    """Pure-JAX reference of the PyTorch module (HIGHEST-precision convs).
    Note: keeps the b1 add, validating that dropping it in the kernel is exact."""
    y = lax.conv_general_dilated(
        x, w1, window_strides=(1, 1), padding=((1, 1), (1, 1)),
        dimension_numbers=("NCHW", "OIHW", "NCHW"),
        precision=lax.Precision.HIGHEST)
    y = y + b1.reshape(1, -1, 1, 1)
    mean = jnp.mean(y, axis=(2, 3), keepdims=True)
    var = jnp.mean((y - mean) ** 2, axis=(2, 3), keepdims=True)
    y = (y - mean) * lax.rsqrt(var + eps)
    y = jnp.where(y >= 0, y, neg_slope * y)
    y = y + x
    out = lax.conv_general_dilated(
        y, w2, window_strides=(1, 1), padding="VALID",
        dimension_numbers=("NCHW", "OIHW", "NCHW"),
        precision=lax.Precision.HIGHEST)
    return out + b2.reshape(1, -1, 1, 1)


if __name__ == "__main__":
    # Small shapes consistent with the module's forward (NCHW input).
    N, C, H, W = 2, 4, 16, 16

    key = jax.random.PRNGKey(0)
    kx, kw1, kb1, kw2, kb2 = jax.random.split(key, 5)

    x = jax.random.normal(kx, (N, C, H, W), dtype=jnp.float32)

    # Deterministic parameter init (PyTorch-like uniform scaling).
    fan1 = C * 3 * 3
    lim1 = 1.0 / (fan1 ** 0.5)
    w1 = jax.random.uniform(kw1, (C, C, 3, 3), jnp.float32, -lim1, lim1)
    b1 = jax.random.uniform(kb1, (C,), jnp.float32, -lim1, lim1)

    fan2 = C * 1 * 1
    lim2 = 1.0 / (fan2 ** 0.5)
    w2 = jax.random.uniform(kw2, (3, C, 1, 1), jnp.float32, -lim2, lim2)
    b2 = jax.random.uniform(kb2, (3,), jnp.float32, -lim2, lim2)

    out = jax.block_until_ready(final_layer_forward(x, w1, b1, w2, b2))
    assert out.shape == (N, 3, H, W)

    # Check against a pure-JAX reference; both paths use HIGHEST-precision
    # f32 matmuls/convs, so a tight tolerance is justified.
    ref = jax.block_until_ready(_reference(x, w1, b1, w2, b2))
    err = float(jnp.max(jnp.abs(out - ref)))
    assert err < 1e-4, f"max abs err {err}"

    print("KERNEL_OK")
</pallas_src>

<mosaic_0001>
module attributes {stable_mosaic.version = 11 : i64} {
  func.func @_final_layer_kernel(%arg0: i32, %arg1: memref<2x8x256xf32, #tpu.memory_space<vmem>>, %arg2: memref<72x256xf32, #tpu.memory_space<vmem>>, %arg3: memref<4x72xf32, #tpu.memory_space<vmem>>, %arg4: memref<3x4xf32, #tpu.memory_space<vmem>>, %arg5: memref<3x1xf32, #tpu.memory_space<vmem>>, %arg6: memref<2x3x256xf32, #tpu.memory_space<vmem>>) attributes {dimension_semantics = [#tpu.dimension_semantics<parallel>], iteration_bounds = array<i64: 1>, scalar_prefetch = 0 : i64, scratch_operands = 0 : i64, tpu.core_type = #tpu.core_type<tc>, window_params = [{transform_indices = @transform_0, window_bounds = array<i64: 2, 8, 256>}, {pipeline_mode = #tpu.pipeline_mode<synchronous>, transform_indices = @transform_1, window_bounds = array<i64: 72, 256>}, {pipeline_mode = #tpu.pipeline_mode<synchronous>, transform_indices = @transform_2, window_bounds = array<i64: 4, 72>}, {pipeline_mode = #tpu.pipeline_mode<synchronous>, transform_indices = @transform_3, window_bounds = array<i64: 3, 4>}, {pipeline_mode = #tpu.pipeline_mode<synchronous>, transform_indices = @transform_4, window_bounds = array<i64: 3, 1>}, {transform_indices = @transform_5, window_bounds = array<i64: 2, 3, 256>}]} {
    %c0 = arith.constant 0 : index
    %c0_0 = arith.constant 0 : index
    %0 = vector.load %arg2[%c0, %c0_0] : memref<72x256xf32, #tpu.memory_space<vmem>>, vector<72x256xf32>
    %c0_1 = arith.constant 0 : index
    %c0_2 = arith.constant 0 : index
    %c0_3 = arith.constant 0 : index
    %1 = vector.load %arg1[%c0_1, %c0_2, %c0_3] : memref<2x8x256xf32, #tpu.memory_space<vmem>>, vector<1x8x256xf32>
    %2 = vector.shape_cast %1 : vector<1x8x256xf32> to vector<8x256xf32>
    %c1 = arith.constant 1 : index
    %c0_4 = arith.constant 0 : index
    %c0_5 = arith.constant 0 : index
    %3 = vector.load %arg1[%c1, %c0_4, %c0_5] : memref<2x8x256xf32, #tpu.memory_space<vmem>>, vector<1x8x256xf32>
    %4 = vector.shape_cast %3 : vector<1x8x256xf32> to vector<8x256xf32>
    %c17_i32 = arith.constant 17 : i32
    %5 = tpu.dynamic_rotate %2 by %c17_i32 dim 1 : vector<8x256xf32>, i32 -> vector<8x256xf32>
    %c16_i32 = arith.constant 16 : i32
    %6 = tpu.dynamic_rotate %2 by %c16_i32 dim 1 : vector<8x256xf32>, i32 -> vector<8x256xf32>
    %c15_i32 = arith.constant 15 : i32
    %7 = tpu.dynamic_rotate %2 by %c15_i32 dim 1 : vector<8x256xf32>, i32 -> vector<8x256xf32>
    %c1_i32 = arith.constant 1 : i32
    %8 = tpu.dynamic_rotate %2 by %c1_i32 dim 1 : vector<8x256xf32>, i32 -> vector<8x256xf32>
    %c255_i32 = arith.constant 255 : i32
    %9 = tpu.dynamic_rotate %2 by %c255_i32 dim 1 : vector<8x256xf32>, i32 -> vector<8x256xf32>
    %c241_i32 = arith.constant 241 : i32
    %10 = tpu.dynamic_rotate %2 by %c241_i32 dim 1 : vector<8x256xf32>, i32 -> vector<8x256xf32>
    %c240_i32 = arith.constant 240 : i32
    %11 = tpu.dynamic_rotate %2 by %c240_i32 dim 1 : vector<8x256xf32>, i32 -> vector<8x256xf32>
    %c239_i32 = arith.constant 239 : i32
    %12 = tpu.dynamic_rotate %2 by %c239_i32 dim 1 : vector<8x256xf32>, i32 -> vector<8x256xf32>
    %13 = tpu.concatenate %5, %6, %7, %8, %2, %9, %10, %11, %12 in 0 : vector<8x256xf32>, vector<8x256xf32>, vector<8x256xf32>, vector<8x256xf32>, vector<8x256xf32>, vector<8x256xf32>, vector<8x256xf32>, vector<8x256xf32>, vector<8x256xf32> -> vector<72x256xf32>
    %14 = arith.mulf %13, %0 : vector<72x256xf32>
    %c17_i32_6 = arith.constant 17 : i32
    %15 = tpu.dynamic_rotate %4 by %c17_i32_6 dim 1 : vector<8x256xf32>, i32 -> vector<8x256xf32>
    %c16_i32_7 = arith.constant 16 : i32
    %16 = tpu.dynamic_rotate %4 by %c16_i32_7 dim 1 : vector<8x256xf32>, i32 -> vector<8x256xf32>
    %c15_i32_8 = arith.constant 15 : i32
    %17 = tpu.dynamic_rotate %4 by %c15_i32_8 dim 1 : vector<8x256xf32>, i32 -> vector<8x256xf32>
    %c1_i32_9 = arith.constant 1 : i32
    %18 = tpu.dynamic_rotate %4 by %c1_i32_9 dim 1 : vector<8x256xf32>, i32 -> vector<8x256xf32>
    %c255_i32_10 = arith.constant 255 : i32
    %19 = tpu.dynamic_rotate %4 by %c255_i32_10 dim 1 : vector<8x256xf32>, i32 -> vector<8x256xf32>
    %c241_i32_11 = arith.constant 241 : i32
    %20 = tpu.dynamic_rotate %4 by %c241_i32_11 dim 1 : vector<8x256xf32>, i32 -> vector<8x256xf32>
    %c240_i32_12 = arith.constant 240 : i32
    %21 = tpu.dynamic_rotate %4 by %c240_i32_12 dim 1 : vector<8x256xf32>, i32 -> vector<8x256xf32>
    %c239_i32_13 = arith.constant 239 : i32
    %22 = tpu.dynamic_rotate %4 by %c239_i32_13 dim 1 : vector<8x256xf32>, i32 -> vector<8x256xf32>
    %23 = tpu.concatenate %15, %16, %17, %18, %4, %19, %20, %21, %22 in 0 : vector<8x256xf32>, vector<8x256xf32>, vector<8x256xf32>, vector<8x256xf32>, vector<8x256xf32>, vector<8x256xf32>, vector<8x256xf32>, vector<8x256xf32>, vector<8x256xf32> -> vector<72x256xf32>
    %24 = arith.mulf %23, %0 : vector<72x256xf32>
    %25 = tpu.concatenate %14, %24 in 1 : vector<72x256xf32>, vector<72x256xf32> -> vector<72x512xf32>
    %c0_14 = arith.constant 0 : index
    %c0_15 = arith.constant 0 : index
    %26 = vector.load %arg3[%c0_14, %c0_15] : memref<4x72xf32, #tpu.memory_space<vmem>>, vector<4x72xf32>
    %cst = arith.constant dense<0.000000e+00> : vector<4x512xf32>
    %27 = tpu.matmul %26, %25, %cst {dimension_numbers = #tpu.dot_dimension_numbers<[1], [0], [0], [1], [0, 0, 1, 1], [], []>, precision = #tpu.contract_precision<fp32>} : vector<4x72xf32>, vector<72x512xf32>, vector<4x512xf32> -> vector<4x512xf32>
    %28 = vector.extract_strided_slice %27 {offsets = [0, 0], sizes = [4, 256], strides = [1, 1]} : vector<4x512xf32> to vector<4x256xf32>
    %cst_16 = arith.constant dense<0.000000e+00> : vector<4xf32>
    %29 = vector.multi_reduction <add>, %28, %cst_16 [1] : vector<4x256xf32> to vector<4xf32>
    %30 = vector.shape_cast %29 : vector<4xf32> to vector<4x1xf32>
    %cst_17 = arith.constant 2.560000e+02 : f32
    %31 = vector.broadcast %cst_17 : f32 to vector<4x1xf32>
    %32 = arith.divf %30, %31 : vector<4x1xf32>
    %33 = vector.broadcast %32 : vector<4x1xf32> to vector<4x256xf32>
    %34 = arith.subf %28, %33 : vector<4x256xf32>
    %35 = arith.mulf %34, %34 : vector<4x256xf32>
    %cst_18 = arith.constant dense<0.000000e+00> : vector<4xf32>
    %36 = vector.multi_reduction <add>, %35, %cst_18 [1] : vector<4x256xf32> to vector<4xf32>
    %37 = vector.shape_cast %36 : vector<4xf32> to vector<4x1xf32>
    %cst_19 = arith.constant 2.560000e+02 : f32
    %38 = vector.broadcast %cst_19 : f32 to vector<4x1xf32>
    %39 = arith.divf %37, %38 : vector<4x1xf32>
    %cst_20 = arith.constant 9.99999974E-6 : f32
    %40 = vector.broadcast %cst_20 : f32 to vector<4x1xf32>
    %41 = arith.addf %39, %40 : vector<4x1xf32>
    %42 = math.rsqrt %41 : vector<4x1xf32>
    %43 = vector.broadcast %42 : vector<4x1xf32> to vector<4x256xf32>
    %44 = arith.mulf %34, %43 : vector<4x256xf32>
    %cst_21 = arith.constant 0.000000e+00 : f32
    %45 = vector.broadcast %cst_21 : f32 to vector<4x256xf32>
    %46 = arith.cmpf oge, %44, %45 : vector<4x256xf32>
    %cst_22 = arith.constant 0.00999999977 : f32
    %47 = vector.broadcast %cst_22 : f32 to vector<4x256xf32>
    %48 = arith.mulf %47, %44 : vector<4x256xf32>
    %49 = arith.select %46, %44, %48 : vector<4x256xi1>, vector<4x256xf32>
    %50 = vector.extract_strided_slice %2 {offsets = [0, 0], sizes = [4, 256], strides = [1, 1]} : vector<8x256xf32> to vector<4x256xf32>
    %51 = arith.addf %49, %50 : vector<4x256xf32>
    %52 = vector.extract_strided_slice %27 {offsets = [0, 256], sizes = [4, 256], strides = [1, 1]} : vector<4x512xf32> to vector<4x256xf32>
    %cst_23 = arith.constant dense<0.000000e+00> : vector<4xf32>
    %53 = vector.multi_reduction <add>, %52, %cst_23 [1] : vector<4x256xf32> to vector<4xf32>
    %54 = vector.shape_cast %53 : vector<4xf32> to vector<4x1xf32>
    %cst_24 = arith.constant 2.560000e+02 : f32
    %55 = vector.broadcast %cst_24 : f32 to vector<4x1xf32>
    %56 = arith.divf %54, %55 : vector<4x1xf32>
    %57 = vector.broadcast %56 : vector<4x1xf32> to vector<4x256xf32>
    %58 = arith.subf %52, %57 : vector<4x256xf32>
    %59 = arith.mulf %58, %58 : vector<4x256xf32>
    %cst_25 = arith.constant dense<0.000000e+00> : vector<4xf32>
    %60 = vector.multi_reduction <add>, %59, %cst_25 [1] : vector<4x256xf32> to vector<4xf32>
    %61 = vector.shape_cast %60 : vector<4xf32> to vector<4x1xf32>
    %cst_26 = arith.constant 2.560000e+02 : f32
    %62 = vector.broadcast %cst_26 : f32 to vector<4x1xf32>
    %63 = arith.divf %61, %62 : vector<4x1xf32>
    %cst_27 = arith.constant 9.99999974E-6 : f32
    %64 = vector.broadcast %cst_27 : f32 to vector<4x1xf32>
    %65 = arith.addf %63, %64 : vector<4x1xf32>
    %66 = math.rsqrt %65 : vector<4x1xf32>
    %67 = vector.broadcast %66 : vector<4x1xf32> to vector<4x256xf32>
    %68 = arith.mulf %58, %67 : vector<4x256xf32>
    %cst_28 = arith.constant 0.000000e+00 : f32
    %69 = vector.broadcast %cst_28 : f32 to vector<4x256xf32>
    %70 = arith.cmpf oge, %68, %69 : vector<4x256xf32>
    %cst_29 = arith.constant 0.00999999977 : f32
    %71 = vector.broadcast %cst_29 : f32 to vector<4x256xf32>
    %72 = arith.mulf %71, %68 : vector<4x256xf32>
    %73 = arith.select %70, %68, %72 : vector<4x256xi1>, vector<4x256xf32>
    %74 = vector.extract_strided_slice %4 {offsets = [0, 0], sizes = [4, 256], strides = [1, 1]} : vector<8x256xf32> to vector<4x256xf32>
    %75 = arith.addf %73, %74 : vector<4x256xf32>
    %76 = tpu.concatenate %51, %75 in 1 : vector<4x256xf32>, vector<4x256xf32> -> vector<4x512xf32>
    %c0_30 = arith.constant 0 : index
    %c0_31 = arith.constant 0 : index
    %77 = vector.load %arg4[%c0_30, %c0_31] : memref<3x4xf32, #tpu.memory_space<vmem>>, vector<3x4xf32>
    %cst_32 = arith.constant dense<0.000000e+00> : vector<3x512xf32>
    %78 = tpu.matmul %77, %76, %cst_32 {dimension_numbers = #tpu.dot_dimension_numbers<[1], [0], [0], [1], [0, 0, 1, 1], [], []>, precision = #tpu.contract_precision<fp32>} : vector<3x4xf32>, vector<4x512xf32>, vector<3x512xf32> -> vector<3x512xf32>
    %c0_33 = arith.constant 0 : index
    %c0_34 = arith.constant 0 : index
    %79 = vector.load %arg5[%c0_33, %c0_34] : memref<3x1xf32, #tpu.memory_space<vmem>>, vector<3x1xf32>
    %80 = vector.broadcast %79 : vector<3x1xf32> to vector<3x512xf32>
    %81 = arith.addf %78, %80 : vector<3x512xf32>
    %82 = vector.extract_strided_slice %81 {offsets = [0, 0], sizes = [3, 256], strides = [1, 1]} : vector<3x512xf32> to vector<3x256xf32>
    %c0_35 = arith.constant 0 : index
    %c0_36 = arith.constant 0 : index
    %c0_37 = arith.constant 0 : index
    %83 = vector.load %arg6[%c0_35, %c0_36, %c0_37] : memref<2x3x256xf32, #tpu.memory_space<vmem>>, vector<1x3x256xf32>
    %84 = vector.shape_cast %83 : vector<1x3x256xf32> to vector<3x256xf32>
    %85 = vector.shape_cast %82 : vector<3x256xf32> to vector<1x3x256xf32>
    tpu.vector_store %arg6[%c0_35, %c0_36, %c0_37], %85 {strides = array<i32>} : memref<2x3x256xf32, #tpu.memory_space<vmem>>, vector<1x3x256xf32>,
    %86 = vector.extract_strided_slice %81 {offsets = [0, 256], sizes = [3, 256], strides = [1, 1]} : vector<3x512xf32> to vector<3x256xf32>
    %c1_38 = arith.constant 1 : index
    %c0_39 = arith.constant 0 : index
    %c0_40 = arith.constant 0 : index
    %87 = vector.load %arg6[%c1_38, %c0_39, %c0_40] : memref<2x3x256xf32, #tpu.memory_space<vmem>>, vector<1x3x256xf32>
    %88 = vector.shape_cast %87 : vector<1x3x256xf32> to vector<3x256xf32>
    %89 = vector.shape_cast %86 : vector<3x256xf32> to vector<1x3x256xf32>
    tpu.vector_store %arg6[%c1_38, %c0_39, %c0_40], %89 {strides = array<i32>} : memref<2x3x256xf32, #tpu.memory_space<vmem>>, vector<1x3x256xf32>,
    return
  }
  func.func @transform_0(%arg0: i32) -> (i32, i32, i32) {
    %c0_i32 = arith.constant 0 : i32
    %c0_i32_0 = arith.constant 0 : i32
    %c0_i32_1 = arith.constant 0 : i32
    return %arg0, %c0_i32, %c0_i32_0 : i32, i32, i32
  }
  func.func @transform_1(%arg0: i32) -> (i32, i32) {
    %c0_i32 = arith.constant 0 : i32
    %c0_i32_0 = arith.constant 0 : i32
    %c0_i32_1 = arith.constant 0 : i32
    return %c0_i32, %c0_i32_0 : i32, i32
  }
  func.func @transform_2(%arg0: i32) -> (i32, i32) {
    %c0_i32 = arith.constant 0 : i32
    %c0_i32_0 = arith.constant 0 : i32
    %c0_i32_1 = arith.constant 0 : i32
    return %c0_i32, %c0_i32_0 : i32, i32
  }
  func.func @transform_3(%arg0: i32) -> (i32, i32) {
    %c0_i32 = arith.constant 0 : i32
    %c0_i32_0 = arith.constant 0 : i32
    %c0_i32_1 = arith.constant 0 : i32
    return %c0_i32, %c0_i32_0 : i32, i32
  }
  func.func @transform_4(%arg0: i32) -> (i32, i32) {
    %c0_i32 = arith.constant 0 : i32
    %c0_i32_0 = arith.constant 0 : i32
    %c0_i32_1 = arith.constant 0 : i32
    return %c0_i32, %c0_i32_0 : i32, i32
  }
  func.func @transform_5(%arg0: i32) -> (i32, i32, i32) {
    %c0_i32 = arith.constant 0 : i32
    %c0_i32_0 = arith.constant 0 : i32
    %c0_i32_1 = arith.constant 0 : i32
    return %arg0, %c0_i32, %c0_i32_0 : i32, i32, i32
  }
}

</mosaic_0001>

<bundles_post_ra>
// kernel: tpu_custom_call.1
= control target key start
LH: loop header
LB: loop body
LE: loop exit
PB: predicated region body
PF: predicated region fallthrough
CT: control target
= control target key end

     0   :  { %10 = vsyncpa [#allocation3], 0  ;;  %s3580_s0 = inlined_call_operand.hbm [shape: f32[2,8,256], index: 0, kind: input, shape index: {}]   ;;  %s3581_s1 = inlined_call_operand.hbm [shape: f32[72,256], index: 1, kind: input, shape index: {}]   ;;  %s3582_s2 = inlined_call_operand.vmem [shape: f32[4,72], index: 2, kind: input, shape index: {}]   ;;  %s3583_s3 = inlined_call_operand.vmem [shape: f32[3,4], index: 3, kind: input, shape index: {}]   ;;  %s3584_s4 = inlined_call_operand.vmem [shape: f32[3,1], index: 4, kind: input, shape index: {}]   ;;  %s3585_s5 = inlined_call_operand.vmem [shape: f32[2,3,256], index: 5, kind: output, shape index: {}]  }
   0x1   :  { %11 = vsyncpa [#allocation5], 0  ;;  %s2660_s18 = smov [#allocation2]  }
   0x2   :  { %s17_s19 = sshll.u32 %s2660_s18, 4  ;;  %s18_s19 = int_to_ptr.vmem [resolvable:$true] %s17_s19 }
   0x3   :  { %s2624_s20 = scalar_lea.vmem %s18_s19, 512  ;;  %p2629_p1 = scmp.lt.s32.totalorder %s18_s19, %s18_s19 }
   0x4   :  { %p2625_p0 = scmp.ne.s32.totalorder %s18_s19, %s2624_s20  ;;  %p2630_p2 = scmp.lt.s32.totalorder %s2624_s20, %s2624_s20 }
   0x6   :  { %p2631_p3 = por %p2630_p2, %p2629_p1 }
   0x8   :  { %p2632_p4 = pnand %p2631_p3, %p2625_p0 }
   0xa   :  { %2635 = shalt.err (!%p2632_p4)
}
   0xb   :  { %s2661_s21 = smov 256   ;;  %s2662_s22 = smov 16  }
   0xc   :  { %23 = dma.hbm_to_vmem [thread:$0]  %s3580_s0, 512, %s18_s19, [#allocation3], %s2661_s21, %s2661_s21, %s2662_s22  }
   0xd   :  { %s2663_s25 = smov [#allocation4]  }
   0xe   :  { %s29_s26 = sshll.u32 %s2663_s25, 4  ;;  %s30_s26 = int_to_ptr.vmem [resolvable:$true] %s29_s26 }
   0xf   :  { %s2644_s27 = scalar_lea.vmem %s30_s26, 2304  ;;  %p2649_p6 = scmp.lt.s32.totalorder %s30_s26, %s30_s26 }
  0x10   :  { %p2645_p5 = scmp.ne.s32.totalorder %s30_s26, %s2644_s27  ;;  %p2650_p7 = scmp.lt.s32.totalorder %s2644_s27, %s2644_s27 }
  0x12   :  { %p2651_p8 = por %p2650_p7, %p2649_p6 }
  0x14   :  { %p2652_p9 = pnand %p2651_p8, %p2645_p5 }
  0x16   :  { %2655 = shalt.err (!%p2652_p9)
}
  0x17   :  { %35 = dma.hbm_to_vmem [thread:$0]  %s3581_s1, 2304, %s30_s26, [#allocation5], %s2661_s21, %s2661_s21, %s2662_s22  }
  0x18   :  { %2656 = dma.done.wait [#allocation3], 512  }
  0x19   :  { %2657 = vsyncadd [#allocation3], 4294966784 }
  0x1a   :  { %2658 = dma.done.wait [#allocation5], 2304  }
  0x1b   :  { %2659 = vsyncadd [#allocation5], 4294964992  ;;  %v66_v0 = vld [vmem:[#allocation2] sm:$0xff]  ;;  %s2664_s0 = smov 112   ;;  %s2665_s30 = smov 111   ;;  %v67_v1 = vld [vmem:[#allocation2 + $0x8] sm:$0xff]  ;;  %v75_v9 = vlaneseq }
  0x1c   :  { %115 = vrot.lane.b32.xlu1 %v66_v0, %s2664_s0  ;;  %122 = vrot.lane.b32.xlu0 %v66_v0, %s2665_s30  ;;  %s2666_s6 = smov 113   ;;  %s2667_s7 = smov 127   ;;  %v3594_v2 = vmov 0.0   ;;  %v2717_v3 = vld [vmem:[#allocation2 + $0x18] sm:$0xff]  ;;  %v2719_v4 = vld [vmem:[#allocation2 + $0x10] sm:$0xff]  ;;  %v2741_v5 = vld [vmem:[#allocation4 + $0x48] sm:$0xff] }
  0x1d   :  { %s2668_s1 = smov 1   ;;  %s2669_s8 = smov 15   ;;  %300 = vmatprep.mubr.f32.mxu0 %v3594_v2  ;;  %466 = vmatprep.mubr.f32.mxu1 %v3594_v2  ;;  %v2743_v6 = vld [vmem:[#allocation4 + $0x40] sm:$0xff]  ;;  %v138_v7 = vmul.f32 %v67_v1, %v2741_v5  ;;  %v2751_v12 = vand.u32 127, %v75_v9  ;;  %v2760_v17 = vld [vmem:[#allocation4 + $0x70] sm:$0xff]  ;;  %v2763_v18 = vld [vmem:[#allocation4 + $0x78] sm:$0xff] }
  0x1e   :  { %s2671_s9 = smov 17   ;;  %v137_v8 = vmul.f32 %v66_v0, %v2743_v6  ;;  %v2765_v19 = vld [vmem:[#allocation4 + $0x80] sm:$0xff]  ;;  %v2767_v20 = vld [vmem:[#allocation4 + $0x88] sm:$0xff]  ;;  %vm214_vm3 = vcmask 588800   ;;  %v2832_v53 = vld [vmem:[#allocation4 + $0x50] sm:$0xff]  ;;  %vm1564_vm9 = vcmask 1043456  }
  0x1f   :  { %v2747_v10 = vand.u32 4294901760, %v138_v7  ;;  %vm119_vm0 = vcmp.lt.s32.totalorder %v2751_v12, 112  ;;  %vm126_vm1 = vcmp.lt.s32.totalorder %v2751_v12, 111  ;;  %vm112_vm2 = vcmp.lt.s32.totalorder %v2751_v12, 113  ;;  %v213_v25 = vld [vmem:[%s3582_s2] sm:$0xf] }
  0x20   :  { %117 = vrot.lane.b32.xlu1 %v67_v1, %s2664_s0  ;;  %124 = vrot.lane.b32.xlu0 %v67_v1, %s2665_s30  ;;  %v2749_v11 = vand.u32 4294901760, %v137_v8  ;;  %vm105_vm4 = vcmp.lt.s32.totalorder %v2751_v12, 127  ;;  %v216_v35 = vsel %vm214_vm3, %v213_v25, 0  ;;  %v2801_v42 = vld [vmem:[#allocation4 + $0x60] sm:$0xff]  ;;  %v2803_v43 = vld [vmem:[#allocation4 + $0x68] sm:$0xff]  ;;  %vm98_vm5 = vcmp.lt.s32.totalorder %v2751_v12, 1 }
  0x21   :  { %v2754_v13 = vsub.f32 %v138_v7, %v2747_v10  ;;  %vm91_vm6 = vcmp.lt.s32.totalorder %v2751_v12, 15  ;;  %v2834_v54 = vld [vmem:[#allocation4 + $0x58] sm:$0xff]  ;;  %v2837_v56 = vand.u32 4294901760, %v216_v35  ;;  %vm84_vm7 = vcmp.lt.s32.totalorder %v2751_v12, 16  ;;  %v2869_v25 = vld [vmem:[#allocation4 + $0x30] sm:$0xff] }
  0x22   :  { %v2757_v16 = vsub.f32 %v137_v8, %v2749_v11  ;;  %3621 = vst [vmem:[#allocation8_spill] sm:$0xff] %v2869_v25  ;;  %vm77_vm8 = vcmp.lt.s32.totalorder %v2751_v12, 17  ;;  %vm1629_vm10 = vcmask 31744  }
  0x23   :  { %v3587_v21 = vand.u32 4294901760, %v2754_v13 }
  0x24   :  { %110 = vrot.lane.b32.xlu1 %v67_v1, %s2666_s6  ;;  %108 = vrot.lane.b32.xlu0 %v66_v0, %s2666_s6  ;;  %v3586_v24 = vand.u32 4294901760, %v2757_v16 }
  0x25   :  { %v2791_v34 = vsub.f32 %v2754_v13, %v3587_v21 }
  0x26   :  { %v2813_v46 = vsub.f32 %v2757_v16, %v3586_v24 }
  0x28   :  { %103 = vrot.lane.b32.xlu1 %v67_v1, %s2667_s7  ;;  %101 = vrot.lane.b32.xlu0 %v66_v0, %s2667_s7 }
  0x2c   :  { %96 = vrot.lane.b32.xlu1 %v67_v1, %s2668_s1  ;;  %94 = vrot.lane.b32.xlu0 %v66_v0, %s2668_s1 }
  0x30   :  { %89 = vrot.lane.b32.xlu1 %v67_v1, %s2669_s8  ;;  %87 = vrot.lane.b32.xlu0 %v66_v0, %s2669_s8 }
  0x34   :  { %82 = vrot.lane.b32.xlu1 %v67_v1, %s2662_s22  ;;  %80 = vrot.lane.b32.xlu0 %v66_v0, %s2662_s22 }
  0x38   :  { %73 = vrot.lane.b32.xlu1 %v67_v1, %s2671_s9  ;;  %71 = vrot.lane.b32.xlu0 %v66_v0, %s2671_s9 }
  0x3c   :  { %191 = vrot.lane.b32.xlu1 %v2717_v3, %s2665_s30  ;;  %189 = vrot.lane.b32.xlu0 %v2719_v4, %s2665_s30 }
  0x40   :  { %185 = vrot.lane.b32.xlu1 %v2717_v3, %s2664_s0  ;;  %183 = vrot.lane.b32.xlu0 %v2719_v4, %s2664_s0 }
  0x44   :  { %179 = vrot.lane.b32.xlu1 %v2717_v3, %s2666_s6  ;;  %177 = vrot.lane.b32.xlu0 %v2719_v4, %s2666_s6 }
  0x48   :  { %173 = vrot.lane.b32.xlu1 %v2717_v3, %s2667_s7  ;;  %171 = vrot.lane.b32.xlu0 %v2719_v4, %s2667_s7 }
  0x4c   :  { %167 = vrot.lane.b32.xlu1 %v2717_v3, %s2668_s1  ;;  %165 = vrot.lane.b32.xlu0 %v2719_v4, %s2668_s1 }
  0x50   :  { %161 = vrot.lane.b32.xlu1 %v2717_v3, %s2669_s8  ;;  %159 = vrot.lane.b32.xlu0 %v2719_v4, %s2669_s8 }
  0x54   :  { %155 = vrot.lane.b32.xlu1 %v2717_v3, %s2662_s22  ;;  %153 = vrot.lane.b32.xlu0 %v2719_v4, %s2662_s22 }
  0x58   :  { %149 = vrot.lane.b32.xlu1 %v2717_v3, %s2671_s9  ;;  %147 = vrot.lane.b32.xlu0 %v2719_v4, %s2671_s9 }
  0x8e   :  { %v116_v14 = vpop.permute.xlu1 %115  ;;  %v123_v15 = vpop.permute.xlu0 %122 }
  0x92   :  { %v118_v22 = vpop.permute.xlu1 %117  ;;  %v125_v23 = vpop.permute.xlu0 %124 }
  0x93   :  { %v120_v26 = vsel %vm119_vm0, %v116_v14, %v118_v22  ;;  %v121_v27 = vsel %vm119_vm0, %v118_v22, %v116_v14  ;;  %v127_v28 = vsel %vm126_vm1, %v123_v15, %v125_v23  ;;  %v128_v29 = vsel %vm126_vm1, %v125_v23, %v123_v15 }
  0x94   :  { %v143_v30 = vmul.f32 %v120_v26, %v2760_v17  ;;  %v144_v31 = vmul.f32 %v121_v27, %v2763_v18  ;;  %v145_v32 = vmul.f32 %v127_v28, %v2765_v19  ;;  %v146_v33 = vmul.f32 %v128_v29, %v2767_v20  ;;  %v2871_v26 = vld [vmem:[#allocation4 + $0x38] sm:$0xff] }
  0x95   :  { %3622 = vst [vmem:[#allocation9_spill] sm:$0xff] %v2871_v26 }
  0x96   :  { %v2793_v36 = vand.u32 4294901760, %v144_v31  ;;  %v2795_v37 = vand.u32 4294901760, %v143_v30  ;;  %v2797_v38 = vand.u32 4294901760, %v146_v33  ;;  %v2799_v39 = vand.u32 4294901760, %v145_v32  ;;  %v111_v40 = vpop.permute.xlu1 %110  ;;  %v109_v41 = vpop.permute.xlu0 %108 }
  0x97   :  { %v113_v44 = vsel %vm112_vm2, %v109_v41, %v111_v40  ;;  %v114_v45 = vsel %vm112_vm2, %v111_v40, %v109_v41 }
  0x98   :  { %v2816_v47 = vsub.f32 %v144_v31, %v2793_v36  ;;  %v2819_v48 = vsub.f32 %v143_v30, %v2795_v37  ;;  %v2822_v49 = vsub.f32 %v146_v33, %v2797_v38  ;;  %v2825_v50 = vsub.f32 %v145_v32, %v2799_v39  ;;  %233 = vmatprep.subr.mxu0 %v2797_v38 }
  0x99   :  { %v141_v51 = vmul.f32 %v113_v44, %v2801_v42  ;;  %v142_v52 = vmul.f32 %v114_v45, %v2803_v43  ;;  %235 = vmatpush1.msra.mxu0 %v2799_v39 }
  0x9a   :  { %v104_v57 = vpop.permute.xlu1 %103  ;;  %v102_v58 = vpop.permute.xlu0 %101  ;;  %237 = vmatprep.subr.mxu0 %v2793_v36  ;;  %v3592_v59 = vand.u32 4294901760, %v2822_v49  ;;  %v3590_v60 = vand.u32 4294901760, %v2825_v50  ;;  %v3589_v61 = vand.u32 4294901760, %v2816_v47  ;;  %v3588_v62 = vand.u32 4294901760, %v2819_v48 }
  0x9b   :  { %v2844_v63 = vand.u32 4294901760, %v142_v52  ;;  %v2846_v0 = vand.u32 4294901760, %v141_v51  ;;  %v106_v1 = vsel %vm105_vm4, %v102_v58, %v104_v57  ;;  %v107_v7 = vsel %vm105_vm4, %v104_v57, %v102_v58  ;;  %239 = vmatpush1.msra.mxu0 %v2795_v37 }
  0x9c   :  { %v139_v8 = vmul.f32 %v106_v1, %v2832_v53  ;;  %v140_v9 = vmul.f32 %v107_v7, %v2834_v54  ;;  %v329_v14 = vsub.f32 %v2822_v49, %v3592_v59  ;;  %v335_v15 = vsub.f32 %v2825_v50, %v3590_v60  ;;  %v2903_v7 = vld [vmem:[#allocation4 + $0x20] sm:$0xff]  ;;  %v2941_v59 = vld [vmem:[#allocation4 + $0x18] sm:$0xff] }
  0x9d   :  { %v2863_v22 = vsub.f32 %v142_v52, %v2844_v63  ;;  %v2866_v23 = vsub.f32 %v141_v51, %v2846_v0  ;;  %241 = vmatprep.subr.mxu0 %v2844_v63  ;;  %v341_v27 = vsub.f32 %v2816_v47, %v3589_v61  ;;  %v347_v28 = vsub.f32 %v2819_v48, %v3588_v62 }
  0x9e   :  { %v2879_v29 = vand.u32 4294901760, %v140_v9  ;;  %v2881_v30 = vand.u32 4294901760, %v139_v8  ;;  %243 = vmatpush1.msra.mxu0 %v2846_v0  ;;  %v97_v31 = vpop.permute.xlu1 %96  ;;  %v95_v32 = vpop.permute.xlu0 %94  ;;  %v330_v33 = vand.u32 4294901760, %v329_v14  ;;  %v336_v40 = vand.u32 4294901760, %v335_v15  ;;  %3623 = vst [vmem:[#allocation10_spill] sm:$0xff] %v2903_v7  ;;  %3627 = vst [vmem:[#allocation14_spill] sm:$0xff] %v2941_v59 }
  0x9f   :  { %v99_v41 = vsel %vm98_vm5, %v95_v32, %v97_v31  ;;  %v100_v44 = vsel %vm98_vm5, %v97_v31, %v95_v32  ;;  %v2890_v51 = vsub.f32 %v216_v35, %v2837_v56  ;;  %v2905_v35 = vld [vmem:[#allocation4 + $0x28] sm:$0xff]  ;;  %v348_v14 = vand.u32 4294901760, %v347_v28 }
  0xa0   :  { %v2893_v52 = vsub.f32 %v140_v9, %v2879_v29  ;;  %v2896_v57 = vsub.f32 %v139_v8, %v2881_v30  ;;  %v135_v58 = vmul.f32 %v100_v44, %v2869_v25  ;;  %v136_v1 = vmul.f32 %v99_v41, %v2871_v26  ;;  %245 = vmatprep.subr.mxu0 %v2879_v29 }
  0xa1   :  { %331 = vmatprep.subr.mxu1 %v330_v33  ;;  %247 = vmatpush1.msra.mxu0 %v2881_v30  ;;  %3624 = vst [vmem:[#allocation11_spill] sm:$0xff] %v2905_v35  ;;  %v342_v9 = vand.u32 4294901760, %v341_v27  ;;  %v3591_v8 = vand.u32 4294901760, %v2863_v22  ;;  %v3593_v15 = vand.u32 4294901760, %v2866_v23  ;;  %v2925_v21 = vand.u32 4294901760, %v2890_v51 }
  0xa2   :  { %v2909_v31 = vand.u32 4294901760, %v136_v1  ;;  %v2911_v32 = vand.u32 4294901760, %v135_v58  ;;  %337 = vmatpush1.msra.mxu1 %v336_v40  ;;  %v90_v41 = vpop.permute.xlu1 %89  ;;  %v88_v44 = vpop.permute.xlu0 %87  ;;  %249 = vmatprep.subr.mxu0 %v2747_v10  ;;  %v3596_v33 = vand.u32 4294901760, %v2893_v52  ;;  %v3597_v24 = vand.u32 4294901760, %v2896_v57 }
  0xa3   :  { %v92_v27 = vsel %vm91_vm6, %v88_v44, %v90_v41  ;;  %v93_v28 = vsel %vm91_vm6, %v90_v41, %v88_v44  ;;  %343 = vmatprep.subr.mxu1 %v342_v9  ;;  %251 = vmatpush1.msra.mxu0 %v2749_v11  ;;  %v353_v40 = vsub.f32 %v2863_v22, %v3591_v8  ;;  %v2939_v8 = vld [vmem:[#allocation4 + $0x10] sm:$0xff] }
  0xa4   :  { %3625 = vst [vmem:[#allocation12_spill] sm:$0xff] %v2925_v21  ;;  %v2928_v62 = vsub.f32 %v136_v1, %v2909_v31  ;;  %v2931_v61 = vsub.f32 %v135_v58, %v2911_v32  ;;  %v133_v60 = vmul.f32 %v93_v28, %v2903_v7  ;;  %v134_v41 = vmul.f32 %v92_v27, %v2905_v35 }
  0xa5   :  { %349 = vmatpush1.msra.mxu1 %v348_v14  ;;  %253 = vmatprep.subr.mxu0 %v2909_v31  ;;  %v354_v9 = vand.u32 4294901760, %v353_v40  ;;  %v359_v44 = vsub.f32 %v2866_v23, %v3593_v15  ;;  %3626 = vst [vmem:[#allocation13_spill] sm:$0xff] %v2939_v8  ;;  %v365_v58 = vsub.f32 %v2893_v52, %v3596_v33 }
  0xa6   :  { %v371_v1 = vsub.f32 %v2896_v57, %v3597_v24  ;;  %v2949_v14 = vand.u32 4294901760, %v134_v41  ;;  %v2951_v27 = vand.u32 4294901760, %v133_v60  ;;  %255 = vmatpush1.msra.mxu0 %v2911_v32  ;;  %v83_v28 = vpop.permute.xlu1 %82  ;;  %v81_v40 = vpop.permute.xlu0 %80  ;;  %v3603_v2 = vand.u32 4294901760, %v2931_v61 }
  0xa7   :  { %355 = vmatprep.subr.mxu1 %v354_v9  ;;  %v360_v45 = vand.u32 4294901760, %v359_v44  ;;  %v85_v33 = vsel %vm84_vm7, %v81_v40, %v83_v28  ;;  %v86_v24 = vsel %vm84_vm7, %v83_v28, %v81_v40  ;;  %v366_v55 = vand.u32 4294901760, %v365_v58  ;;  %v2970_v44 = vld [vmem:[#allocation4] sm:$0xff]  ;;  %v2972_v28 = vld [vmem:[#allocation4 + $0x8] sm:$0xff] }
  0xa8   :  { %3628 = vst [vmem:[#allocation15_spill] sm:$0xff] %v2949_v14  ;;  %3629 = vst [vmem:[#allocation16_spill] sm:$0xff] %v2951_v27  ;;  %v2961_v7 = vsub.f32 %v134_v41, %v2949_v14  ;;  %v2964_v35 = vsub.f32 %v133_v60, %v2951_v27  ;;  %v131_v25 = vmul.f32 %v86_v24, %v2939_v8  ;;  %257 = vmatprep.subr.mxu0 %v2949_v14 }
  0xa9   :  { %v132_v15 = vmul.f32 %v85_v33, %v2941_v59  ;;  %361 = vmatpush1.msra.mxu1 %v360_v45  ;;  %259 = vmatpush1.msra.mxu0 %v2951_v27  ;;  %v372_v9 = vand.u32 4294901760, %v371_v1  ;;  %3630 = vst [vmem:[#allocation17_spill] sm:$0xff] %v2970_v44  ;;  %3631 = vst [vmem:[#allocation18_spill] sm:$0xff] %v2972_v28  ;;  %v3632_v41 = vand.u32 4294901760, %v2928_v62  ;;  %v3634_v59 = vand.u32 4294901760, %v2813_v46 }
  0xaa   :  { %v395_v24 = vsub.f32 %v2931_v61, %v3603_v2  ;;  %v304_v60 = vsub.f32 %v2890_v51, %v2925_v21  ;;  %v2984_v45 = vand.u32 4294901760, %v131_v25  ;;  %367 = vmatprep.subr.mxu1 %v366_v55  ;;  %v74_v1 = vpop.permute.xlu1 %73  ;;  %v72_v40 = vpop.permute.xlu0 %71 }
  0xab   :  { %v389_v58 = vsub.f32 %v2928_v62, %v3632_v41  ;;  %v2982_v33 = vand.u32 4294901760, %v132_v15  ;;  %373 = vmatpush1.msra.mxu1 %v372_v9  ;;  %v78_v41 = vsel %vm77_vm8, %v72_v40, %v74_v1  ;;  %v79_v2 = vsel %vm77_vm8, %v74_v1, %v72_v40 }
  0xac   :  { %v396_v21 = vand.u32 4294901760, %v395_v24  ;;  %v2996_v55 = vsub.f32 %v131_v25, %v2984_v45  ;;  %v129_v14 = vmul.f32 %v79_v2, %v2970_v44  ;;  %v130_v8 = vmul.f32 %v78_v41, %v2972_v28 }
  0xad   :  { %v390_v26 = vand.u32 4294901760, %v389_v58  ;;  %v2993_v27 = vsub.f32 %v132_v15, %v2982_v33  ;;  %v3633_v9 = vand.u32 4294901760, %v2791_v34  ;;  %261 = vmatprep.subr.mxu0 %v2982_v33  ;;  %v3635_v58 = vand.u32 4294901760, %v2961_v7 }
  0xae   :  { %v3636_v24 = vand.u32 4294901760, %v2964_v35  ;;  %v3011_v1 = vand.u32 4294901760, %v304_v60  ;;  %v3013_v2 = vand.u32 4294901760, %v130_v8  ;;  %v3015_v40 = vand.u32 4294901760, %v129_v14  ;;  %263 = vmatpush1.msra.mxu0 %v2984_v45  ;;  %v190_v41 = vpop.permute.xlu0 %189 }
  0xaf   :  { %379 = vmatprep.subr.mxu1 %v3633_v9  ;;  %v401_v15 = vsub.f32 %v2961_v7, %v3635_v58  ;;  %v3612_v34 = vand.u32 4294901760, %v2993_v27  ;;  %v3614_v46 = vand.u32 4294901760, %v2996_v55 }
  0xb0   :  { %385 = vmatpush1.msra.mxu1 %v3634_v59  ;;  %v407_v25 = vsub.f32 %v2964_v35, %v3636_v24  ;;  %v192_v59 = vpop.permute.xlu1 %191  ;;  %v3025_v44 = vsub.f32 %v130_v8, %v3013_v2  ;;  %265 = vmatprep.subr.mxu0 %v3013_v2  ;;  %v3663_v12 = vld [vmem:[#allocation18_spill] sm:$0xff] }
  0xb1   :  { %391 = vmatprep.subr.mxu1 %v390_v26  ;;  %v402_v9 = vand.u32 4294901760, %v401_v15  ;;  %v193_v60 = vsel %vm126_vm1, %v190_v41, %v192_v59  ;;  %v194_v24 = vsel %vm126_vm1, %v192_v59, %v190_v41  ;;  %v3028_v26 = vsub.f32 %v129_v14, %v3015_v40  ;;  %267 = vmatpush1.msra.mxu0 %v3015_v40 }
  0xb2   :  { %397 = vmatpush1.msra.mxu1 %v396_v21  ;;  %v408_v58 = vand.u32 4294901760, %v407_v25  ;;  %v413_v21 = vsub.f32 %v2993_v27, %v3612_v34  ;;  %v419_v15 = vsub.f32 %v2996_v55, %v3614_v46  ;;  %v3039_v25 = vmul.f32 %v193_v60, %v2765_v19  ;;  %490 = vmatprep.subr.mxu0 %v2822_v49  ;;  %v184_v46 = vpop.permute.xlu0 %183 }
  0xb3   :  { %403 = vmatprep.subr.mxu1 %v402_v9  ;;  %v3042_v8 = vmul.f32 %v194_v24, %v2767_v20  ;;  %v424_v41 = vand.u32 4294901760, %v3025_v44  ;;  %v430_v34 = vand.u32 4294901760, %v3028_v26  ;;  %306 = vmatmul.mubr.f32.vlgmr.msra.gmra.mxu0 %v3011_v1 }
  0xb4   :  { %409 = vmatpush1.msra.mxu1 %v408_v58  ;;  %v414_v14 = vand.u32 4294901760, %v413_v21  ;;  %v420_v59 = vand.u32 4294901760, %v419_v15  ;;  %v186_v28 = vpop.permute.xlu1 %185  ;;  %493 = vmatpush1.msra.mxu0 %v2825_v50  ;;  %v3637_v21 = vmov 0.0  }
  0xb5   :  { %v187_v19 = vsel %vm119_vm0, %v184_v46, %v186_v28  ;;  %v188_v20 = vsel %vm119_vm0, %v186_v28, %v184_v46  ;;  %v425_v9 = vsub.f32 %v3025_v44, %v424_v41  ;;  %v431_v58 = vsub.f32 %v3028_v26, %v430_v34  ;;  %496 = vmatprep.subr.mxu0 %v2816_v47 }
  0xb6   :  { %415 = vmatprep.subr.mxu1 %v414_v14  ;;  %v3060_v60 = vmul.f32 %v187_v19, %v2760_v17  ;;  %v3064_v24 = vmul.f32 %v188_v20, %v2763_v18  ;;  %499 = vmatpush1.msra.mxu0 %v2819_v48  ;;  %v178_v14 = vpop.permute.xlu0 %177 }
  0xb7   :  { %421 = vmatpush1.msra.mxu1 %v420_v59  ;;  %v426_v28 = vand.u32 4294901760, %v425_v9  ;;  %v432_v46 = vand.u32 4294901760, %v431_v58  ;;  %574 = vmatprep.mubr.f32.mxu0 %v3637_v21 }
  0xb8   :  { %v180_v15 = vpop.permute.xlu1 %179  ;;  %502 = vmatprep.subr.mxu0 %v2863_v22 }
  0xb9   :  { %v181_v17 = vsel %vm112_vm2, %v178_v14, %v180_v15  ;;  %v182_v19 = vsel %vm112_vm2, %v180_v15, %v178_v14  ;;  %505 = vmatpush1.msra.mxu0 %v2866_v23  ;;  %427 = vmatprep.subr.mxu1 %v426_v28  ;;  %v3638_v15 = vand.u32 4294901760, %v2822_v49  ;;  %v203_v14 = vmul.f32 %v2719_v4, %v2743_v6 }
  0xba   :  { %v3075_v18 = vmul.f32 %v181_v17, %v2801_v42  ;;  %v3078_v59 = vmul.f32 %v182_v19, %v2803_v43  ;;  %508 = vmatprep.subr.mxu0 %v2893_v52  ;;  %433 = vmatpush1.msra.mxu1 %v432_v46  ;;  %v172_v9 = vpop.permute.xlu0 %171  ;;  %v204_v46 = vmul.f32 %v2717_v3, %v2741_v5  ;;  %v3639_v17 = vand.u32 4294901760, %v2825_v50  ;;  %v3640_v19 = vld [vmem:[#allocation15_spill] sm:$0xff] }
  0xbb   :  { %511 = vmatpush1.msra.mxu0 %v2896_v57  ;;  %468 = vmatmul.mubr.f32.vlgmr.msra.gmra.mxu1 %v2837_v56  ;;  %v3643_v3 = vand.u32 4294901760, %v2819_v48  ;;  %v3644_v49 = vand.u32 4294901760, %v2863_v22  ;;  %v3136_v4 = vand.u32 4294901760, %v203_v14  ;;  %v3645_v6 = vand.u32 4294901760, %v2866_v23 }
  0xbc   :  { %v174_v20 = vpop.permute.xlu1 %173  ;;  %514 = vmatprep.subr.mxu0 %v2754_v13  ;;  %598 = vmatprep.subr.mxu1 %v2797_v38  ;;  %v3131_v5 = vand.u32 4294901760, %v204_v46  ;;  %v3646_v48 = vand.u32 4294901760, %v2893_v52  ;;  %v3647_v22 = vand.u32 4294901760, %v2896_v57  ;;  %v3649_v23 = vand.u32 4294901760, %v2754_v13 }
  0xbd   :  { %v175_v42 = vsel %vm105_vm4, %v172_v9, %v174_v20  ;;  %v176_v43 = vsel %vm105_vm4, %v174_v20, %v172_v9  ;;  %517 = vmatpush1.msra.mxu0 %v2757_v16  ;;  %600 = vmatpush1.msra.mxu1 %v2799_v39  ;;  %v3641_v20 = vand.u32 4294901760, %v2816_v47  ;;  %v3642_v9 = vld [vmem:[#allocation16_spill] sm:$0xff]  ;;  %v3157_v52 = vand.u32 4294901760, %v3039_v25 }
  0xbe   :  { %v3092_v58 = vmul.f32 %v175_v42, %v2832_v53  ;;  %520 = vmatprep.subr.mxu0 %v2928_v62  ;;  %602 = vmatprep.subr.mxu1 %v2793_v36  ;;  %v3097_v28 = vmul.f32 %v176_v43, %v2834_v54  ;;  %v166_v54 = vpop.permute.xlu0 %165  ;;  %v3148_v42 = vsub.f32 %v204_v46, %v3131_v5  ;;  %v3648_v43 = vld [vmem:[#allocation12_spill] sm:$0xff]  ;;  %v3651_v57 = vand.u32 4294901760, %v2928_v62 }
  0xbf   :  { %523 = vmatpush1.msra.mxu0 %v2931_v61  ;;  %604 = vmatpush1.msra.mxu1 %v2795_v37  ;;  %v3166_v46 = vand.u32 4294901760, %v3042_v8  ;;  %v3652_v13 = vand.u32 4294901760, %v2931_v61  ;;  %v3654_v61 = vand.u32 4294901760, %v2964_v35 }
  0xc0   :  { %526 = vmatprep.subr.mxu0 %v2961_v7  ;;  %606 = vmatprep.subr.mxu1 %v2844_v63  ;;  %v168_v53 = vpop.permute.xlu1 %167 }
  0xc1   :  { %529 = vmatpush1.msra.mxu0 %v2964_v35  ;;  %608 = vmatpush1.msra.mxu1 %v2846_v0  ;;  %v170_v35 = vsel %vm98_vm5, %v168_v53, %v166_v54 }
  0xc2   :  { %532 = vmatprep.subr.mxu0 %v2993_v27  ;;  %610 = vmatprep.subr.mxu1 %v2879_v29  ;;  %v160_v50 = vpop.permute.xlu0 %159 }
  0xc3   :  { %535 = vmatpush1.msra.mxu0 %v2996_v55  ;;  %612 = vmatpush1.msra.mxu1 %v2881_v30 }
  0xc4   :  { %538 = vmatprep.subr.mxu0 %v3025_v44  ;;  %614 = vmatprep.subr.mxu1 %v2747_v10  ;;  %v162_v47 = vpop.permute.xlu1 %161 }
  0xc5   :  { %541 = vmatpush1.msra.mxu0 %v3028_v26  ;;  %616 = vmatpush1.msra.mxu1 %v2749_v11  ;;  %v3659_v26 = vld [vmem:[#allocation11_spill] sm:$0xff] }
  0xc6   :  { %577 = vmatmul.mubr.f32.vlgmr.msra.gmra.mxu0 %v2890_v51  ;;  %618 = vmatprep.subr.mxu1 %v2909_v31 }
  0xc7   :  { %692 = vmatprep.subr.mxu0 %v3638_v15  ;;  %620 = vmatpush1.msra.mxu1 %v2911_v32  ;;  %v3154_v15 = vsub.f32 %v203_v14, %v3136_v4 }
  0xc8   :  { %696 = vmatpush1.msra.mxu0 %v3639_v17  ;;  %622 = vmatprep.subr.mxu1 %v3640_v19  ;;  %v3650_v17 = vand.u32 4294901760, %v2757_v16  ;;  %v156_v14 = vpop.permute.xlu1 %155  ;;  %v3173_v16 = vand.u32 4294901760, %v3064_v24 }
  0xc9   :  { %700 = vmatprep.subr.mxu0 %v3641_v20  ;;  %624 = vmatpush1.msra.mxu1 %v3642_v9  ;;  %v154_v20 = vpop.permute.xlu0 %153  ;;  %v3615_v62 = vand.u32 4294901760, %v3154_v15 }
  0xca   :  { %704 = vmatpush1.msra.mxu0 %v3643_v3  ;;  %626 = vmatprep.subr.mxu1 %v2982_v33  ;;  %v3187_v3 = vand.u32 4294901760, %v3060_v60 }
  0xcb   :  { %708 = vmatprep.subr.mxu0 %v3644_v49  ;;  %628 = vmatpush1.msra.mxu1 %v2984_v45  ;;  %v3656_v49 = vand.u32 4294901760, %v2996_v55  ;;  %v3226_v55 = vsub.f32 %v3154_v15, %v3615_v62 }
  0xcc   :  { %712 = vmatpush1.msra.mxu0 %v3645_v6  ;;  %630 = vmatprep.subr.mxu1 %v3013_v2  ;;  %v150_v44 = vpop.permute.xlu1 %149 }
  0xcd   :  { %716 = vmatprep.subr.mxu0 %v3646_v48  ;;  %632 = vmatpush1.msra.mxu1 %v3015_v40  ;;  %v3240_v48 = vsub.f32 %v3060_v60, %v3187_v3  ;;  %v158_v60 = vsel %vm84_vm7, %v156_v14, %v154_v20 }
  0xce   :  { %665 = vmatprep.mubr.f32.mxu1 %v3637_v21  ;;  %720 = vmatpush1.msra.mxu0 %v3647_v22  ;;  %v3243_v22 = vand.u32 4294901760, %v3092_v58 }
  0xcf   :  { %669 = vmatmul.mubr.f32.vlgmr.msra.gmra.mxu1 %v3648_v43  ;;  %724 = vmatprep.subr.mxu0 %v3649_v23  ;;  %v3658_v23 = vld [vmem:[#allocation8_spill] sm:$0xff] }
  0xd0   :  { %816 = vmatprep.subr.mxu1 %v2797_v38  ;;  %728 = vmatpush1.msra.mxu0 %v3650_v17  ;;  %v3616_v38 = vand.u32 4294901760, %v3148_v42  ;;  %v201_v17 = vmul.f32 %v170_v35, %v3658_v23 }
  0xd1   :  { %818 = vmatpush1.msra.mxu1 %v2799_v39  ;;  %732 = vmatprep.subr.mxu0 %v3651_v57  ;;  %v3653_v39 = vand.u32 4294901760, %v2961_v7  ;;  %v3655_v7 = vand.u32 4294901760, %v2993_v27  ;;  %v3213_v27 = vsub.f32 %v3064_v24, %v3173_v16  ;;  %v3230_v24 = vand.u32 4294901760, %v3097_v28  ;;  %v3660_v57 = vld [vmem:[#allocation10_spill] sm:$0xff] }
  0xd2   :  { %820 = vmatprep.subr.mxu1 %v2793_v36  ;;  %736 = vmatpush1.msra.mxu0 %v3652_v13  ;;  %v3181_v36 = vsub.f32 %v3039_v25, %v3157_v52  ;;  %v3196_v25 = vsub.f32 %v3042_v8, %v3166_v46  ;;  %v3216_v8 = vand.u32 4294901760, %v3075_v18 }
  0xd3   :  { %822 = vmatpush1.msra.mxu1 %v2795_v37  ;;  %740 = vmatprep.subr.mxu0 %v3653_v39  ;;  %v169_v37 = vsel %vm98_vm5, %v166_v54, %v168_v53  ;;  %v3657_v54 = vld [vmem:[#allocation9_spill] sm:$0xff] }
  0xd4   :  { %824 = vmatprep.subr.mxu1 %v2844_v63  ;;  %744 = vmatpush1.msra.mxu0 %v3654_v61  ;;  %v3199_v63 = vand.u32 4294901760, %v3078_v59  ;;  %v1007_v53 = vand.u32 4294901760, %v3181_v36  ;;  %v202_v6 = vmul.f32 %v169_v37, %v3657_v54  ;;  %v1019_v61 = vand.u32 4294901760, %v3240_v48 }
  0xd5   :  { %826 = vmatpush1.msra.mxu1 %v2846_v0  ;;  %748 = vmatprep.subr.mxu0 %v3655_v7  ;;  %v3209_v0 = vsub.f32 %v3148_v42, %v3616_v38  ;;  %v3284_v37 = vsub.f32 %v3092_v58, %v3243_v22  ;;  %v3286_v7 = vand.u32 4294901760, %v201_v17 }
  0xd6   :  { %828 = vmatprep.subr.mxu1 %v2879_v29  ;;  %752 = vmatpush1.msra.mxu0 %v3656_v49  ;;  %v163_v29 = vsel %vm91_vm6, %v160_v50, %v162_v47 }
  0xd7   :  { %830 = vmatpush1.msra.mxu1 %v2881_v30  ;;  %756 = vmatprep.subr.mxu0 %v424_v41  ;;  %v164_v30 = vsel %vm91_vm6, %v162_v47, %v160_v50  ;;  %v148_v41 = vpop.permute.xlu0 %147  ;;  %v200_v47 = vmul.f32 %v163_v29, %v3659_v26  ;;  %v1001_v50 = vand.u32 4294901760, %v3196_v25  ;;  %v3618_v26 = vand.u32 4294901760, %v3284_v37 }
  0xd8   :  { %832 = vmatprep.subr.mxu1 %v2747_v10  ;;  %760 = vmatpush1.msra.mxu0 %v430_v34  ;;  %v157_v10 = vsel %vm84_vm7, %v154_v20, %v156_v14  ;;  %v3252_v34 = vsub.f32 %v3078_v59, %v3199_v63  ;;  %v199_v13 = vmul.f32 %v164_v30, %v3660_v57  ;;  %v3274_v20 = vand.u32 4294901760, %v202_v6 }
  0xd9   :  { %793 = vmatprep.mubr.f32.mxu0 %v3637_v21  ;;  %834 = vmatpush1.msra.mxu1 %v2749_v11  ;;  %v3262_v11 = vsub.f32 %v3075_v18, %v3216_v8  ;;  %v151_v59 = vsel %vm77_vm8, %v148_v41, %v150_v44  ;;  %v3272_v14 = vsub.f32 %v3097_v28, %v3230_v24  ;;  %v3661_v18 = vld [vmem:[#allocation14_spill] sm:$0xff]  ;;  %v3662_v28 = vld [vmem:[#allocation13_spill] sm:$0xff]  ;;  %v3291_v49 = vand.u32 4294901760, %v200_v47 }
  0xda   :  { %795 = vmatmul.mubr.f32.vlgmr.msra.gmra.mxu0 %v2837_v56  ;;  %836 = vmatprep.subr.mxu1 %v2909_v31  ;;  %v1013_v31 = vand.u32 4294901760, %v3213_v27  ;;  %v198_v39 = vmul.f32 %v157_v10, %v3661_v18  ;;  %v197_v35 = vmul.f32 %v158_v60, %v3662_v28  ;;  %v1002_v58 = vsub.f32 %v3196_v25, %v1001_v50 }
  0xdb   :  { %906 = vmatprep.subr.mxu0 %v3166_v46  ;;  %838 = vmatpush1.msra.mxu1 %v2911_v32  ;;  %v152_v32 = vsel %vm77_vm8, %v150_v44, %v148_v41  ;;  %v1025_v29 = vand.u32 4294901760, %v3252_v34  ;;  %v3619_v54 = vand.u32 4294901760, %v3262_v11  ;;  %v3301_v30 = vand.u32 4294901760, %v199_v13 }
  0xdc   :  { %908 = vmatpush1.msra.mxu0 %v3157_v52  ;;  %840 = vmatprep.subr.mxu1 %v3640_v19  ;;  %v196_v19 = vmul.f32 %v151_v59, %v3663_v12  ;;  %v3310_v41 = vsub.f32 %v202_v6, %v3274_v20  ;;  %v3312_v23 = vand.u32 4294901760, %v198_v39  ;;  %v1014_v10 = vsub.f32 %v3213_v27, %v1013_v31 }
  0xdd   :  { %910 = vmatprep.subr.mxu0 %v3173_v16  ;;  %842 = vmatpush1.msra.mxu1 %v3642_v9  ;;  %v3664_v9 = vld [vmem:[#allocation17_spill] sm:$0xff]  ;;  %v3322_v60 = vsub.f32 %v201_v17, %v3286_v7  ;;  %v3324_v57 = vand.u32 4294901760, %v197_v35  ;;  %v3332_v6 = vsub.f32 %v200_v47, %v3291_v49  ;;  %v1003_v17 = vand.u32 4294901760, %v1002_v58 }
  0xde   :  { %912 = vmatpush1.msra.mxu0 %v3187_v3  ;;  %844 = vmatprep.subr.mxu1 %v2982_v33  ;;  %v195_v44 = vmul.f32 %v152_v32, %v3664_v9  ;;  %v1008_v33 = vsub.f32 %v3181_v36, %v1007_v53  ;;  %v3334_v59 = vand.u32 4294901760, %v196_v19  ;;  %v1026_v18 = vsub.f32 %v3252_v34, %v1025_v29 }
  0xdf   :  { %914 = vmatprep.subr.mxu0 %v3199_v63  ;;  %846 = vmatpush1.msra.mxu1 %v2984_v45  ;;  %v3617_v45 = vand.u32 4294901760, %v3272_v14  ;;  %v1032_v28 = vsub.f32 %v3262_v11, %v3619_v54  ;;  %v3352_v12 = vsub.f32 %v198_v39, %v3312_v23  ;;  %v1015_v58 = vand.u32 4294901760, %v1014_v10 }
  0xe0   :  { %916 = vmatpush1.msra.mxu0 %v3216_v8  ;;  %848 = vmatprep.subr.mxu1 %v3013_v2  ;;  %v1020_v2 = vsub.f32 %v3240_v48, %v1019_v61  ;;  %v3344_v32 = vand.u32 4294901760, %v195_v44  ;;  %v1009_v47 = vand.u32 4294901760, %v1008_v33  ;;  %v1061_v9 = vand.u32 4294901760, %v3310_v41 }
  0xe1   :  { %918 = vmatprep.subr.mxu0 %v3230_v24  ;;  %850 = vmatpush1.msra.mxu1 %v3015_v40  ;;  %v3342_v40 = vsub.f32 %v199_v13, %v3301_v30  ;;  %v1038_v13 = vsub.f32 %v3272_v14, %v3617_v45  ;;  %v1067_v62 = vand.u32 4294901760, %v3322_v60  ;;  %v3361_v33 = vsub.f32 %v197_v35, %v3324_v57 }
  0xe2   :  { %883 = vmatprep.mubr.f32.mxu1 %v3637_v21  ;;  %920 = vmatpush1.msra.mxu0 %v3243_v22  ;;  %v1021_v39 = vand.u32 4294901760, %v1020_v2  ;;  %v3368_v10 = vsub.f32 %v196_v19, %v3334_v59  ;;  %v1027_v38 = vand.u32 4294901760, %v1026_v18  ;;  %v1073_v45 = vand.u32 4294901760, %v3332_v6 }
  0xe3   :  { %885 = vmatmul.mubr.f32.vlgmr.msra.gmra.mxu1 %v2837_v56  ;;  %922 = vmatprep.subr.mxu0 %v3131_v5  ;;  %v3620_v35 = vand.u32 4294901760, %v3342_v40  ;;  %v1033_v2 = vand.u32 4294901760, %v1032_v28  ;;  %v1039_v19 = vand.u32 4294901760, %v1038_v13  ;;  %v1062_v18 = vsub.f32 %v3310_v41, %v1061_v9 }
  0xe4   :  { %1004 = vmatprep.subr.mxu1 %v1003_v17  ;;  %924 = vmatpush1.msra.mxu0 %v3136_v4  ;;  %v1044_v17 = vsub.f32 %v3284_v37, %v3618_v26  ;;  %v1085_v26 = vand.u32 4294901760, %v3352_v12  ;;  %v1091_v54 = vand.u32 4294901760, %v3361_v33  ;;  %v1057_v28 = vand.u32 4294901760, %v3226_v55 }
  0xe5   :  { %1010 = vmatpush1.msra.mxu1 %v1009_v47  ;;  %926 = vmatprep.subr.mxu0 %v3274_v20  ;;  %v3374_v47 = vsub.f32 %v195_v44, %v3344_v32  ;;  %v1097_v13 = vand.u32 4294901760, %v3368_v10  ;;  %v1080_v55 = vsub.f32 %v3342_v40, %v3620_v35 }
  0xe6   :  { %1016 = vmatprep.subr.mxu1 %v1015_v58  ;;  %928 = vmatpush1.msra.mxu0 %v3286_v7  ;;  %v1051_v58 = vand.u32 4294901760, %v3209_v0  ;;  %v1045_v44 = vand.u32 4294901760, %v1044_v17  ;;  %v1074_v0 = vsub.f32 %v3332_v6, %v1073_v45  ;;  %v1063_v17 = vand.u32 4294901760, %v1062_v18 }
  0xe7   :  { %1022 = vmatpush1.msra.mxu1 %v1021_v39  ;;  %930 = vmatprep.subr.mxu0 %v3291_v49  ;;  %v1103_v39 = vand.u32 4294901760, %v3374_v47  ;;  %v1081_v18 = vand.u32 4294901760, %v1080_v55 }
  0xe8   :  { %1028 = vmatprep.subr.mxu1 %v1027_v38  ;;  %932 = vmatpush1.msra.mxu0 %v3301_v30  ;;  %v1068_v38 = vsub.f32 %v3322_v60, %v1067_v62  ;;  %v1075_v35 = vand.u32 4294901760, %v1074_v0 }
  0xe9   :  { %1034 = vmatpush1.msra.mxu1 %v1033_v2  ;;  %934 = vmatprep.subr.mxu0 %v3312_v23  ;;  %v1086_v2 = vsub.f32 %v3352_v12, %v1085_v26 }
  0xea   :  { %1040 = vmatprep.subr.mxu1 %v1039_v19  ;;  %936 = vmatpush1.msra.mxu0 %v3324_v57  ;;  %v1069_v19 = vand.u32 4294901760, %v1068_v38 }
  0xeb   :  { %1046 = vmatpush1.msra.mxu1 %v1045_v44  ;;  %938 = vmatprep.subr.mxu0 %v3334_v59  ;;  %v1092_v44 = vsub.f32 %v3361_v33, %v1091_v54  ;;  %v1087_v38 = vand.u32 4294901760, %v1086_v2 }
  0xec   :  { %1052 = vmatprep.subr.mxu1 %v1051_v58  ;;  %940 = vmatpush1.msra.mxu0 %v3344_v32  ;;  %v1098_v58 = vsub.f32 %v3368_v10, %v1097_v13 }
  0xed   :  { %1058 = vmatpush1.msra.mxu1 %v1057_v28  ;;  %973 = vmatprep.mubr.f32.mxu0 %v3637_v21  ;;  %v1104_v28 = vsub.f32 %v3374_v47, %v1103_v39  ;;  %v1093_v0 = vand.u32 4294901760, %v1092_v44 }
  0xee   :  { %1064 = vmatprep.subr.mxu1 %v1063_v17  ;;  %1163 = vmatprep.subr.mxu0 %v3196_v25  ;;  %v1099_v17 = vand.u32 4294901760, %v1098_v58  ;;  %v3667_v25 = vand.u32 4294901760, %v3284_v37 }
  0xef   :  { %979 = vmatmul.mubr.f32.vlgmr.msra.gmra.mxu0 %v3011_v1  ;;  %1070 = vmatpush1.msra.mxu1 %v1069_v19  ;;  %v1105_v1 = vand.u32 4294901760, %v1104_v28 }
  0xf0   :  { %1166 = vmatpush1.msra.mxu0 %v3181_v36  ;;  %1076 = vmatprep.subr.mxu1 %v1075_v35  ;;  %v3666_v36 = vand.u32 4294901760, %v3272_v14 }
  0xf1   :  { %1169 = vmatprep.subr.mxu0 %v3213_v27  ;;  %1082 = vmatpush1.msra.mxu1 %v1081_v18  ;;  %v3668_v27 = vand.u32 4294901760, %v3148_v42 }
  0xf2   :  { %1172 = vmatpush1.msra.mxu0 %v3240_v48  ;;  %1088 = vmatprep.subr.mxu1 %v1087_v38 }
  0xf3   :  { %1175 = vmatprep.subr.mxu0 %v3252_v34  ;;  %1094 = vmatpush1.msra.mxu1 %v1093_v0 }
  0xf4   :  { %1178 = vmatpush1.msra.mxu0 %v3262_v11  ;;  %1100 = vmatprep.subr.mxu1 %v1099_v17 }
  0xf5   :  { %1181 = vmatprep.subr.mxu0 %v3272_v14  ;;  %1106 = vmatpush1.msra.mxu1 %v1105_v1 }
  0xf6   :  { %1139 = vmatprep.mubr.f32.mxu1 %v3637_v21  ;;  %1184 = vmatpush1.msra.mxu0 %v3284_v37 }
  0xf7   :  { %1141 = vmatmul.mubr.f32.vlgmr.msra.gmra.mxu1 %v2837_v56  ;;  %1187 = vmatprep.subr.mxu0 %v3148_v42  ;;  %v3670_v42 = vand.u32 4294901760, %v3342_v40 }
  0xf8   :  { %1271 = vmatprep.subr.mxu1 %v3166_v46  ;;  %1190 = vmatpush1.msra.mxu0 %v3154_v15 }
  0xf9   :  { %1273 = vmatpush1.msra.mxu1 %v3157_v52  ;;  %1193 = vmatprep.subr.mxu0 %v3310_v41 }
  0xfa   :  { %1275 = vmatprep.subr.mxu1 %v3173_v16  ;;  %1196 = vmatpush1.msra.mxu0 %v3322_v60 }
  0xfb   :  { %1277 = vmatpush1.msra.mxu1 %v3187_v3  ;;  %1199 = vmatprep.subr.mxu0 %v3332_v6 }
  0xfc   :  { %1279 = vmatprep.subr.mxu1 %v3199_v63  ;;  %1202 = vmatpush1.msra.mxu0 %v3342_v40 }
  0xfd   :  { %1281 = vmatpush1.msra.mxu1 %v3216_v8  ;;  %1205 = vmatprep.subr.mxu0 %v3352_v12 }
  0xfe   :  { %1283 = vmatprep.subr.mxu1 %v3230_v24  ;;  %1208 = vmatpush1.msra.mxu0 %v3361_v33 }
  0xff   :  { %1285 = vmatpush1.msra.mxu1 %v3243_v22  ;;  %1211 = vmatprep.subr.mxu0 %v3368_v10 }
 0x100   :  { %1287 = vmatprep.subr.mxu1 %v3131_v5  ;;  %1214 = vmatpush1.msra.mxu0 %v3374_v47 }
 0x101   :  { %1247 = vmatprep.mubr.f32.mxu0 %v3637_v21  ;;  %1289 = vmatpush1.msra.mxu1 %v3136_v4 }
 0x102   :  { %1250 = vmatmul.mubr.f32.vlgmr.msra.gmra.mxu0 %v2890_v51  ;;  %1291 = vmatprep.subr.mxu1 %v3274_v20  ;;  %v3665_v51 = vand.u32 4294901760, %v3262_v11 }
 0x103   :  { %1365 = vmatprep.subr.mxu0 %v1001_v50  ;;  %1293 = vmatpush1.msra.mxu1 %v3286_v7 }
 0x104   :  { %1369 = vmatpush1.msra.mxu0 %v1007_v53  ;;  %1295 = vmatprep.subr.mxu1 %v3291_v49  ;;  %v3669_v53 = vand.u32 4294901760, %v3154_v15 }
 0x105   :  { %1373 = vmatprep.subr.mxu0 %v1013_v31  ;;  %1297 = vmatpush1.msra.mxu1 %v3301_v30 }
 0x106   :  { %1377 = vmatpush1.msra.mxu0 %v1019_v61  ;;  %1299 = vmatprep.subr.mxu1 %v3312_v23 }
 0x107   :  { %1381 = vmatprep.subr.mxu0 %v1025_v29  ;;  %1301 = vmatpush1.msra.mxu1 %v3324_v57 }
 0x108   :  { %1385 = vmatpush1.msra.mxu0 %v3665_v51  ;;  %1303 = vmatprep.subr.mxu1 %v3334_v59 }
 0x109   :  { %1389 = vmatprep.subr.mxu0 %v3666_v36  ;;  %1305 = vmatpush1.msra.mxu1 %v3344_v32 }
 0x10a   :  { %1338 = vmatprep.mubr.f32.mxu1 %v3637_v21  ;;  %1393 = vmatpush1.msra.mxu0 %v3667_v25 }
 0x10b   :  { %1342 = vmatmul.mubr.f32.vlgmr.msra.gmra.mxu1 %v3648_v43  ;;  %1397 = vmatprep.subr.mxu0 %v3668_v27 }
 0x10c   :  { %1489 = vmatprep.subr.mxu1 %v3166_v46  ;;  %1401 = vmatpush1.msra.mxu0 %v3669_v53 }
 0x10d   :  { %1491 = vmatpush1.msra.mxu1 %v3157_v52  ;;  %1405 = vmatprep.subr.mxu0 %v1061_v9 }
 0x10e   :  { %1493 = vmatprep.subr.mxu1 %v3173_v16  ;;  %1409 = vmatpush1.msra.mxu0 %v1067_v62 }
 0x10f   :  { %1495 = vmatpush1.msra.mxu1 %v3187_v3  ;;  %1413 = vmatprep.subr.mxu0 %v1073_v45 }
 0x110   :  { %1497 = vmatprep.subr.mxu1 %v3199_v63  ;;  %1417 = vmatpush1.msra.mxu0 %v3670_v42 }
 0x111   :  { %1499 = vmatpush1.msra.mxu1 %v3216_v8  ;;  %1421 = vmatprep.subr.mxu0 %v1085_v26 }
 0x112   :  { %1501 = vmatprep.subr.mxu1 %v3230_v24  ;;  %1425 = vmatpush1.msra.mxu0 %v1091_v54 }
 0x113   :  { %1503 = vmatpush1.msra.mxu1 %v3243_v22  ;;  %1429 = vmatprep.subr.mxu0 %v1097_v13 }
 0x114   :  { %1505 = vmatprep.subr.mxu1 %v3131_v5  ;;  %1433 = vmatpush1.msra.mxu0 %v1103_v39 }
 0x115   :  { %1466 = vmatprep.mubr.f32.mxu0 %v3637_v21  ;;  %1507 = vmatpush1.msra.mxu1 %v3136_v4 }
 0x116   :  { %1468 = vmatmul.mubr.f32.vlgmr.msra.gmra.mxu0 %v2837_v56  ;;  %1509 = vmatprep.subr.mxu1 %v3274_v20 }
 0x117   :  { %1511 = vmatpush1.msra.mxu1 %v3286_v7  ;;  %1556 = vmatprep.mubr.f32.mxu1 %v3637_v21 }
 0x118   :  { %1513 = vmatprep.subr.mxu1 %v3291_v49  ;;  %1711 = vmatprep.mubr.f32.mxu0 %v3637_v21 }
 0x119   :  { %1515 = vmatpush1.msra.mxu1 %v3301_v30 }
 0x11a   :  { %1517 = vmatprep.subr.mxu1 %v3312_v23 }
 0x11b   :  { %1519 = vmatpush1.msra.mxu1 %v3324_v57 }
 0x11c   :  { %1521 = vmatprep.subr.mxu1 %v3334_v59 }
 0x11d   :  { %1523 = vmatpush1.msra.mxu1 %v3344_v32 }
 0x11e   :  { %1558 = vmatmul.mubr.f32.vlgmr.msra.gmra.mxu1 %v2837_v56 }
 0x11f   :  { %1797 = vmatprep.mubr.f32.mxu1 %v3637_v21 }
 0x173   :  { %v307_v5 = vpop.f32.mrf.mxu0 }
 0x175   :  { %v309_v4 = vpop.f32.mrf.mxu0 }
 0x17b   :  { %v469_v43 = vpop.f32.mrf.mxu1 }
 0x17c   :  { %v470_v62 = vadd.f32 %v469_v43, %v307_v5 }
 0x17d   :  { %v471_v52 = vpop.f32.mrf.mxu1 }
 0x17e   :  { %v472_v63 = vadd.f32 %v471_v52, %v309_v4 }
 0x186   :  { %v578_v15 = vpop.f32.mrf.mxu0 }
 0x187   :  { %v579_v8 = vadd.f32 %v578_v15, %v470_v62 }
 0x188   :  { %v580_v46 = vpop.f32.mrf.mxu0 }
 0x189   :  { %v581_v48 = vadd.f32 %v580_v46, %v472_v63  ;;  %v1623_v46 = vld [vmem:[%s3584_s4] sm:$0x7] }
 0x18f   :  { %v670_v16 = vpop.f32.mrf.mxu1 }
 0x190   :  { %v671_v22 = vadd.f32 %v670_v16, %v579_v8  ;;  %v2672_v16 = vmov 0   ;;  %v1622_v8 = vld [vmem:[%s3583_s3] sm:$0x7] }
 0x191   :  { %v672_v24 = vpop.f32.mrf.mxu1  ;;  %2606 = vset.pattern.permute.xlu1 %v2672_v16  ;;  %2607 = vset.pattern.permute.xlu0 %v2672_v16 }
 0x192   :  { %v673_v50 = vadd.f32 %v672_v24, %v581_v48  ;;  %v1631_v24 = vsel %vm1629_vm10, %v1622_v8, 0 }
 0x193   :  { %v3538_v48 = vand.u32 4294901760, %v1631_v24 }
 0x19a   :  { %v796_v3 = vpop.f32.mrf.mxu0 }
 0x19b   :  { %v797_v11 = vadd.f32 %v796_v3, %v671_v22  ;;  %v3541_v22 = vsub.f32 %v1631_v24, %v3538_v48 }
 0x19c   :  { %v798_v34 = vpop.f32.mrf.mxu0 }
 0x19d   :  { %v799_v31 = vadd.f32 %v798_v34, %v673_v50 }
 0x1a3   :  { %v886_v56 = vpop.f32.mrf.mxu1 }
 0x1a4   :  { %v887_v14 = vadd.f32 %v886_v56, %v797_v11  ;;  %v3544_v56 = vand.u32 4294901760, %v3541_v22 }
 0x1a5   :  { %v888_v20 = vpop.f32.mrf.mxu1 }
 0x1a6   :  { %v889_v61 = vadd.f32 %v888_v20, %v799_v31  ;;  %v1565_v37 = vsel %vm1564_vm9, %v887_v14, 0.0 }
 0x1a8   :  { %v1566_v7 = vsel %vm1564_vm9, %v889_v61, 0.0 }
 0x1a9   :  { %v1567_v49 = vadd.f32 %v1566_v7, %v1565_v37  ;;  %v1715_v37 = vsub.f32 %v3541_v22, %v3544_v56  ;;  %v2612_v7 = vld [vmem:[#allocation2 + $0x8] sm:$0xff] }
 0x1ab   :  { %1568 = vadd.xlane.f32.xlu0 %v1567_v49 }
 0x1af   :  { %v980_v29 = vpop.f32.mrf.mxu0 }
 0x1b1   :  { %v982_v54 = vpop.f32.mrf.mxu0 }
 0x1b7   :  { %v1142_v30 = vpop.f32.mrf.mxu1 }
 0x1b8   :  { %v1143_v60 = vadd.f32 %v1142_v30, %v980_v29  ;;  %v2613_v29 = vld [vmem:[#allocation2] sm:$0xff] }
 0x1b9   :  { %v1144_v23 = vpop.f32.mrf.mxu1 }
 0x1ba   :  { %v1145_v6 = vadd.f32 %v1144_v23, %v982_v54 }
 0x1c2   :  { %v1251_v41 = vpop.f32.mrf.mxu0 }
 0x1c3   :  { %v1252_v59 = vadd.f32 %v1251_v41, %v1143_v60 }
 0x1c4   :  { %v1253_v45 = vpop.f32.mrf.mxu0 }
 0x1c5   :  { %v1254_v32 = vadd.f32 %v1253_v45, %v1145_v6 }
 0x1cb   :  { %v1343_v26 = vpop.f32.mrf.mxu1 }
 0x1cc   :  { %v1344_v12 = vadd.f32 %v1343_v26, %v1252_v59  ;;  %v1716_v26 = vand.u32 4294901760, %v1715_v37 }
 0x1cd   :  { %v1345_v40 = vpop.f32.mrf.mxu1 }
 0x1ce   :  { %v1346_v33 = vadd.f32 %v1345_v40, %v1254_v32 }
 0x1d6   :  { %v1469_v57 = vpop.f32.mrf.mxu0 }
 0x1d7   :  { %v1470_v10 = vadd.f32 %v1469_v57, %v1344_v12 }
 0x1d8   :  { %v1471_v9 = vpop.f32.mrf.mxu0 }
 0x1d9   :  { %v1472_v47 = vadd.f32 %v1471_v9, %v1346_v33 }
 0x1de   :  { %v1559_v35 = vpop.f32.mrf.mxu1 }
 0x1df   :  { %v1560_v13 = vadd.f32 %v1559_v35, %v1470_v10 }
 0x1e0   :  { %v1561_v39 = vpop.f32.mrf.mxu1 }
 0x1e1   :  { %v1562_v55 = vadd.f32 %v1561_v39, %v1472_v47  ;;  %v1594_v2 = vsel %vm1564_vm9, %v1560_v13, 0.0 }
 0x1e3   :  { %v1595_v19 = vsel %vm1564_vm9, %v1562_v55, 0.0 }
 0x1e4   :  { %v1596_v44 = vadd.f32 %v1595_v19, %v1594_v2 }
 0x1e6   :  { %1597 = vadd.xlane.f32.xlu1 %v1596_v44 }
 0x1f7   :  { %1626 = vperm.xlu1 %2606, %v1623_v46  }
 0x234   :  { %v1569_v58 = vpop.xlane.xlu0 %1568 }
 0x235   :  { %v1571_v18 = vmul.f32 0.00390625, %v1569_v58  ;;  %v2614_v58 = vld [vmem:[#allocation2 + $0x18] sm:$0xff] }
 0x237   :  { %v1572_v28 = vsub.f32 %v887_v14, %v1571_v18  ;;  %v1573_v38 = vsub.f32 %v889_v61, %v1571_v18 }
 0x239   :  { %v1574_v0 = vmul.f32 %v1572_v28, %v1572_v28  ;;  %v1575_v17 = vmul.f32 %v1573_v38, %v1573_v38 }
 0x23b   :  { %v1576_v1 = vsel %vm1564_vm9, %v1574_v0, 0.0  ;;  %v1577_v51 = vsel %vm1564_vm9, %v1575_v17, 0.0 }
 0x23c   :  { %v1578_v36 = vadd.f32 %v1577_v51, %v1576_v1 }
 0x23e   :  { %1579 = vadd.xlane.f32.xlu0 %v1578_v36 }
 0x26f   :  { %v1598_v25 = vpop.xlane.xlu1 %1597 }
 0x270   :  { %v1599_v27 = vmul.f32 0.00390625, %v1598_v25 }
 0x272   :  { %v3522_v53 = vsub.f32 %v1560_v13, %v1599_v27  ;;  %v3524_v42 = vsub.f32 %v1562_v55, %v1599_v27 }
 0x274   :  { %v1602_v5 = vmul.f32 %v3522_v53, %v3522_v53  ;;  %v1603_v4 = vmul.f32 %v3524_v42, %v3524_v42 }
 0x276   :  { %v1604_v43 = vsel %vm1564_vm9, %v1602_v5, 0.0  ;;  %v1605_v15 = vsel %vm1564_vm9, %v1603_v4, 0.0 }
 0x277   :  { %v1606_v52 = vadd.f32 %v1605_v15, %v1604_v43 }
 0x279   :  { %1607 = vadd.xlane.f32.xlu0 %v1606_v52  ;;  %v1627_v52 = vpop.permute.xlu1 %1626 }
 0x2c7   :  { %v1580_v62 = vpop.xlane.xlu0 %1579 }
 0x2c8   :  { %v1581_v3 = vmul.f32 0.00390625, %v1580_v62 }
 0x2ca   :  { %v1582_v63 = vadd.f32 1e-05, %v1581_v3 }
 0x2cc   :  { %2608 = vrsqrt.f32 %v1582_v63 }
 0x2d9   :  { %v2609_v34 = vpop.eup %2608 }
 0x2da   :  { %v1584_v50 = vmul.f32 %v2609_v34, %v1572_v28  ;;  %v1585_v11 = vmul.f32 %v2609_v34, %v1573_v38  ;;  %v2615_v28 = vld [vmem:[#allocation2 + $0x10] sm:$0xff] }
 0x2dc   :  { %vm1587_vm11 = vcmp.ge.f32.partialorder %v1585_v11, 0.0  ;;  %v1589_v31 = vmul.f32 0.01, %v1585_v11  ;;  %vm1586_vm12 = vcmp.ge.f32.partialorder %v1584_v50, 0.0  ;;  %v1588_v14 = vmul.f32 0.01, %v1584_v50 }
 0x2de   :  { %v1591_v20 = vsel %vm1587_vm11, %v1585_v11, %v1589_v31  ;;  %v1590_v61 = vsel %vm1586_vm12, %v1584_v50, %v1588_v14 }
 0x2df   :  { %v1593_v49 = vadd.f32 %v2612_v7, %v1591_v20  ;;  %v1592_v54 = vadd.f32 %v2613_v29, %v1590_v61 }
 0x2e1   :  { %v1637_v30 = vsel %vm1564_vm9, %v1593_v49, 0  ;;  %v1634_v41 = vsel %vm1564_vm9, %v1592_v54, 0 }
 0x2e2   :  { %v1675_v23 = vand.u32 4294901760, %v1637_v30  ;;  %v1677_v45 = vand.u32 4294901760, %v1634_v41 }
 0x2e4   :  { %1676 = vmatprep.subr.mxu0 %v1675_v23  ;;  %v1754_v60 = vsub.f32 %v1637_v30, %v1675_v23  ;;  %v1760_v57 = vsub.f32 %v1634_v41, %v1677_v45 }
 0x2e5   :  { %1678 = vmatpush1.msra.mxu0 %v1677_v45 }
 0x2e6   :  { %1717 = vmatmul.mubr.f32.vlgmr.msra.gmra.mxu0 %v1716_v26  ;;  %1837 = vmatprep.subr.mxu0 %v1754_v60  ;;  %v1755_v6 = vand.u32 4294901760, %v1754_v60  ;;  %v1761_v59 = vand.u32 4294901760, %v1760_v57 }
 0x2e7   :  { %1840 = vmatpush1.msra.mxu0 %v1760_v57  ;;  %1873 = vmatprep.mubr.f32.mxu0 %v3637_v21 }
 0x2e8   :  { %1991 = vmatprep.subr.mxu0 %v1755_v6  ;;  %v1756_v40 = vsub.f32 %v1754_v60, %v1755_v6  ;;  %v1762_v32 = vsub.f32 %v1760_v57, %v1761_v59 }
 0x2ea   :  { %1876 = vmatmul.mubr.f32.vlgmr.msra.gmra.mxu0 %v3541_v22  ;;  %v1757_v12 = vand.u32 4294901760, %v1756_v40  ;;  %v1763_v9 = vand.u32 4294901760, %v1762_v32 }
 0x2eb   :  { %1995 = vmatpush1.msra.mxu0 %v1761_v59  ;;  %2028 = vmatprep.mubr.f32.mxu0 %v3637_v21 }
 0x2ec   :  { %1758 = vmatprep.subr.mxu1 %v1757_v12 }
 0x2ed   :  { %1764 = vmatpush1.msra.mxu1 %v1763_v9 }
 0x2ee   :  { %1799 = vmatmul.mubr.f32.vlgmr.msra.gmra.mxu1 %v3538_v48  ;;  %1913 = vmatprep.subr.mxu1 %v1675_v23 }
 0x2ef   :  { %1915 = vmatpush1.msra.mxu1 %v1677_v45  ;;  %1948 = vmatprep.mubr.f32.mxu1 %v3637_v21 }
 0x2f0   :  { %2067 = vmatprep.subr.mxu1 %v1675_v23  ;;  %2030 = vmatmul.mubr.f32.vlgmr.msra.gmra.mxu0 %v3538_v48 }
 0x2f1   :  { %2176 = vmatprep.mubr.f32.mxu0 %v3637_v21 }
 0x2f2   :  { %1952 = vmatmul.mubr.f32.vlgmr.msra.gmra.mxu1 %v3544_v56 }
 0x2f3   :  { %2069 = vmatpush1.msra.mxu1 %v1677_v45  ;;  %2102 = vmatprep.mubr.f32.mxu1 %v3637_v21 }
 0x2f6   :  { %2104 = vmatmul.mubr.f32.vlgmr.msra.gmra.mxu1 %v3538_v48 }
 0x2f7   :  { %2262 = vmatprep.mubr.f32.mxu1 %v3637_v21 }
 0x302   :  { %v1608_v33 = vpop.xlane.xlu0 %1607 }
 0x303   :  { %v1609_v10 = vmul.f32 0.00390625, %v1608_v33 }
 0x305   :  { %v1610_v35 = vadd.f32 1e-05, %v1609_v10 }
 0x307   :  { %2610 = vrsqrt.f32 %v1610_v35 }
 0x314   :  { %v2611_v47 = vpop.eup %2610 }
 0x315   :  { %v1612_v13 = vmul.f32 %v2611_v47, %v3522_v53  ;;  %v1613_v39 = vmul.f32 %v2611_v47, %v3524_v42 }
 0x317   :  { %vm1615_vm13 = vcmp.ge.f32.partialorder %v1613_v39, 0.0  ;;  %v1617_v55 = vmul.f32 0.01, %v1613_v39  ;;  %vm1614_vm14 = vcmp.ge.f32.partialorder %v1612_v13, 0.0  ;;  %v1616_v2 = vmul.f32 0.01, %v1612_v13 }
 0x319   :  { %v1619_v19 = vsel %vm1615_vm13, %v1613_v39, %v1617_v55  ;;  %v1618_v44 = vsel %vm1614_vm14, %v1612_v13, %v1616_v2 }
 0x31a   :  { %v1621_v18 = vadd.f32 %v2614_v58, %v1619_v19  ;;  %v1620_v38 = vadd.f32 %v2615_v28, %v1618_v44 }
 0x31c   :  { %v1643_v0 = vsel %vm1564_vm9, %v1621_v18, 0  ;;  %v1640_v17 = vsel %vm1564_vm9, %v1620_v38, 0 }
 0x31d   :  { %v2140_v1 = vand.u32 4294901760, %v1643_v0  ;;  %v2142_v51 = vand.u32 4294901760, %v1640_v17 }
 0x31f   :  { %2141 = vmatprep.subr.mxu0 %v2140_v1  ;;  %v2219_v36 = vsub.f32 %v1643_v0, %v2140_v1  ;;  %v2225_v25 = vsub.f32 %v1640_v17, %v2142_v51 }
 0x320   :  { %2143 = vmatpush1.msra.mxu0 %v2142_v51 }
 0x321   :  { %2182 = vmatmul.mubr.f32.vlgmr.msra.gmra.mxu0 %v1716_v26  ;;  %2302 = vmatprep.subr.mxu0 %v2219_v36  ;;  %v2220_v27 = vand.u32 4294901760, %v2219_v36  ;;  %v2226_v53 = vand.u32 4294901760, %v2225_v25 }
 0x322   :  { %2305 = vmatpush1.msra.mxu0 %v2225_v25  ;;  %2338 = vmatprep.mubr.f32.mxu0 %v3637_v21 }
 0x323   :  { %2456 = vmatprep.subr.mxu0 %v2220_v27  ;;  %v2221_v42 = vsub.f32 %v2219_v36, %v2220_v27  ;;  %v2227_v5 = vsub.f32 %v2225_v25, %v2226_v53 }
 0x325   :  { %2341 = vmatmul.mubr.f32.vlgmr.msra.gmra.mxu0 %v3541_v22  ;;  %v2222_v4 = vand.u32 4294901760, %v2221_v42  ;;  %v2228_v43 = vand.u32 4294901760, %v2227_v5 }
 0x326   :  { %2460 = vmatpush1.msra.mxu0 %v2226_v53  ;;  %2493 = vmatprep.mubr.f32.mxu0 %v3637_v21 }
 0x327   :  { %2223 = vmatprep.subr.mxu1 %v2222_v4 }
 0x328   :  { %2229 = vmatpush1.msra.mxu1 %v2228_v43 }
 0x329   :  { %2264 = vmatmul.mubr.f32.vlgmr.msra.gmra.mxu1 %v3538_v48  ;;  %2378 = vmatprep.subr.mxu1 %v2140_v1 }
 0x32a   :  { %2380 = vmatpush1.msra.mxu1 %v2142_v51  ;;  %2413 = vmatprep.mubr.f32.mxu1 %v3637_v21 }
 0x32b   :  { %2532 = vmatprep.subr.mxu1 %v2140_v1  ;;  %2495 = vmatmul.mubr.f32.vlgmr.msra.gmra.mxu0 %v3538_v48 }
 0x32d   :  { %2417 = vmatmul.mubr.f32.vlgmr.msra.gmra.mxu1 %v3544_v56 }
 0x32e   :  { %2534 = vmatpush1.msra.mxu1 %v2142_v51  ;;  %2567 = vmatprep.mubr.f32.mxu1 %v3637_v21 }
 0x331   :  { %2569 = vmatmul.mubr.f32.vlgmr.msra.gmra.mxu1 %v3538_v48 }
 0x3a6   :  { %v1718_v15 = vpop.f32.mrf.mxu0 }
 0x3a7   :  { %v1719_v62 = vadd.f32 %v1718_v15, %v1627_v52 }
 0x3a8   :  { %v1720_v46 = vpop.f32.mrf.mxu0 }
 0x3a9   :  { %v1721_v63 = vadd.f32 %v1720_v46, %v1627_v52 }
 0x3aa   :  { %v1877_v16 = vpop.f32.mrf.mxu0 }
 0x3ac   :  { %v1879_v3 = vpop.f32.mrf.mxu0 }
 0x3ae   :  { %v1800_v8 = vpop.f32.mrf.mxu1 }
 0x3af   :  { %v1801_v24 = vadd.f32 %v1800_v8, %v1719_v62 }
 0x3b0   :  { %v1802_v22 = vpop.f32.mrf.mxu1  ;;  %v2031_v34 = vpop.f32.mrf.mxu0 }
 0x3b1   :  { %v1803_v50 = vadd.f32 %v1802_v22, %v1721_v63  ;;  %v1878_v11 = vadd.f32 %v1877_v16, %v1801_v24 }
 0x3b2   :  { %v1953_v31 = vpop.f32.mrf.mxu1  ;;  %v2033_v21 = vpop.f32.mrf.mxu0 }
 0x3b3   :  { %v1880_v56 = vadd.f32 %v1879_v3, %v1803_v50  ;;  %v1954_v14 = vadd.f32 %v1953_v31, %v1878_v11 }
 0x3b4   :  { %v1955_v20 = vpop.f32.mrf.mxu1 }
 0x3b5   :  { %v1956_v61 = vadd.f32 %v1955_v20, %v1880_v56  ;;  %v2032_v48 = vadd.f32 %v2031_v34, %v1954_v14 }
 0x3b6   :  { %v2105_v37 = vpop.f32.mrf.mxu1 }
 0x3b7   :  { %v2034_v7 = vadd.f32 %v2033_v21, %v1956_v61  ;;  %v2106_v49 = vadd.f32 %v2105_v37, %v2032_v48 }
 0x3b8   :  { %v2107_v29 = vpop.f32.mrf.mxu1 }
 0x3b9   :  { %v2108_v54 = vadd.f32 %v2107_v29, %v2034_v7 }
 0x3bb   :  { %v2577_v30 = vcombine.low %v2106_v49, %v2108_v54 }
 0x3bd   :  { %2579 = vst [vmem:[%s3585_s5] sm:$0x77] %v2577_v30 }
 0x3e1   :  { %v2183_v41 = vpop.f32.mrf.mxu0 }
 0x3e2   :  { %v2184_v26 = vadd.f32 %v2183_v41, %v1627_v52 }
 0x3e3   :  { %v2185_v23 = vpop.f32.mrf.mxu0 }
 0x3e4   :  { %v2186_v6 = vadd.f32 %v2185_v23, %v1627_v52 }
 0x3e5   :  { %v2342_v45 = vpop.f32.mrf.mxu0 }
 0x3e7   :  { %v2344_v57 = vpop.f32.mrf.mxu0 }
 0x3e9   :  { %v2265_v60 = vpop.f32.mrf.mxu1 }
 0x3ea   :  { %v2266_v59 = vadd.f32 %v2265_v60, %v2184_v26 }
 0x3eb   :  { %v2267_v40 = vpop.f32.mrf.mxu1  ;;  %v2496_v33 = vpop.f32.mrf.mxu0 }
 0x3ec   :  { %v2268_v32 = vadd.f32 %v2267_v40, %v2186_v6  ;;  %v2343_v12 = vadd.f32 %v2342_v45, %v2266_v59 }
 0x3ed   :  { %v2418_v9 = vpop.f32.mrf.mxu1  ;;  %v2498_v55 = vpop.f32.mrf.mxu0 }
 0x3ee   :  { %v2345_v10 = vadd.f32 %v2344_v57, %v2268_v32  ;;  %v2419_v35 = vadd.f32 %v2418_v9, %v2343_v12 }
 0x3ef   :  { %v2420_v47 = vpop.f32.mrf.mxu1 }
 0x3f0   :  { %v2421_v13 = vadd.f32 %v2420_v47, %v2345_v10  ;;  %v2497_v39 = vadd.f32 %v2496_v33, %v2419_v35 }
 0x3f1   :  { %v2570_v2 = vpop.f32.mrf.mxu1 }
 0x3f2   :  { %v2499_v19 = vadd.f32 %v2498_v55, %v2421_v13  ;;  %v2571_v58 = vadd.f32 %v2570_v2, %v2497_v39 }
 0x3f3   :  { %v2572_v44 = vpop.f32.mrf.mxu1 }
 0x3f4   :  { %v2573_v18 = vadd.f32 %v2572_v44, %v2499_v19 }
 0x3f6   :  { %v2582_v28 = vcombine.low %v2571_v58, %v2573_v18 }
 0x3f8   :  { %2592 = vst [vmem:[%s3585_s5 + $0x8] sm:$0x77] %v2582_v28 }
 0x3f9   :  { %2590 = vsyncpa [#allocation3], 1 }
 0x3fa   :  { %2591 = vsyncpa [#allocation5], 1 }

</bundles_post_ra>
